<compile_context>
chip_gen: v7x
topology: tpu7x:2x2x1
jax: 0.10.0
libtpu: 0.0.40
codegen_flags: <defaults>
</compile_context>

<pallas_src>
import functools
import math

import jax
import jax.numpy as jnp
from jax.experimental import pallas as pl
from jax.experimental.pallas import tpu as pltpu


# ----------------------------------------------------------------------------
# Kernel-side compute
# ----------------------------------------------------------------------------
def _single_query_attention(sp_tok, pool_tok, w_qkv, b_qkv, w_c_t, b_c_row,
                            sel_lb, sel_bl, heads, head_ch):
    """Single-query (pooled-token) attention over the folded lane axis.

    sp_tok  : (C, L)   spatial tokens (positional embedding already added)
    pool_tok: (C, BB)  pooled (mean) tokens, one per batch element in the fold
    w_qkv   : (3C, C)  qkv_proj weight         b_qkv  : (3C, 1)
    w_c_t   : (C, O)   c_proj weight (pre-transposed)   b_c_row: (1, O)
    sel_lb  : (L, BB)  0/1 lane->batch segmented-sum matrix (None if BB == 1)
    sel_bl  : (BB, L)  0/1 batch->lane broadcast matrix     (None if BB == 1)
    returns : (BB, O)  pooled-token output: batch on sublanes, O lane-dense
    """
    H, ch = heads, head_ch
    C, L = sp_tok.shape
    BB = pool_tok.shape[1]
    f32 = jnp.float32

    # qkv projection (1x1 conv == channel matmul), lane-dense in L.
    qkv_sp = jnp.dot(w_qkv, sp_tok, preferred_element_type=f32) + b_qkv     # (3C, L)
    qkv_pl = jnp.dot(w_qkv, pool_tok, preferred_element_type=f32) + b_qkv   # (3C, BB)

    # Only token 0 (pooled) survives the final slice -> single-query attention.
    scale2 = 1.0 / math.sqrt(float(ch))          # == (ch ** -0.25) ** 2
    q = qkv_pl[0 * C:1 * C] * scale2             # (C, BB)
    k_p = qkv_pl[1 * C:2 * C]                    # (C, BB)
    v_p = qkv_pl[2 * C:3 * C]                    # (C, BB)
    k_s = qkv_sp[1 * C:2 * C]                    # (C, L)
    v_s = qkv_sp[2 * C:3 * C]                    # (C, L)

    # Scores: VPU broadcast-multiply + per-head sublane reduction (a ch=8 MXU
    # contraction would waste >90% of the systolic array).
    q_l = q if BB == 1 else jnp.dot(q, sel_bl, preferred_element_type=f32)  # (C, L)
    s_sp = jnp.sum((q_l * k_s).reshape(H, ch, L), axis=1)                   # (H, L)
    s_pl = jnp.sum((q * k_p).reshape(H, ch, BB), axis=1)                    # (H, BB)

    # Numerically-stable softmax over the 1 + S tokens of each batch element.
    # One max per head, shared across the batch fold: still a valid bound and
    # avoids the (H, L)->(H, BB, S) relayout plus a max-broadcast matmul.
    m = jnp.maximum(jnp.max(s_sp, axis=-1, keepdims=True),
                    jnp.max(s_pl, axis=-1, keepdims=True))                  # (H, 1)
    e_sp = jnp.exp(s_sp - m)                                                # (H, L)
    e_pl = jnp.exp(s_pl - m)                                                # (H, BB)
    if BB == 1:
        z = e_pl + jnp.sum(e_sp, axis=-1, keepdims=True)                    # (H, 1)
    else:
        z = e_pl + jnp.dot(e_sp, sel_lb, preferred_element_type=f32)        # (H, BB)
    inv_z = pl.reciprocal(z, approx=False)       # approx=True strains 1e-4 tol

    # Weighted sum of values (one output token per batch element and head).
    wv = (v_s.reshape(H, ch, L) * e_sp[:, None, :]).reshape(C, L)           # (C, L)
    if BB == 1:
        num = jnp.sum(wv, axis=-1, keepdims=True)                           # (C, 1)
    else:
        num = jnp.dot(wv, sel_lb, preferred_element_type=f32)               # (C, BB)
    num = num + (v_p.reshape(H, ch, BB) * e_pl[:, None, :]).reshape(C, BB)
    a = (num.reshape(H, ch, BB) * inv_z[:, None, :]).reshape(C, BB)

    # c_proj on the pooled token, computed as (BB, C) @ (C, O) so the result is
    # lane-dense in O (no masked partial stores, no wrapper transpose).  Only
    # the small (C, BB) tile is transposed in-kernel.
    out = jnp.dot(a.T, w_c_t, preferred_element_type=f32) + b_c_row         # (BB, O)
    return out


def _fold_kernel(x_ref, pos_pool_ref, sel_lb_ref, sel_bl_ref,
                 wqkv_ref, bqkv_ref, wct_ref, bc_ref, o_ref,
                 *, seq, heads, head_ch):
    """BB > 1: batch folded onto lanes; spatial pos-emb pre-added by wrapper."""
    x = x_ref[0]                                 # (C, L) == x + pos_sp per batch
    sel_lb = sel_lb_ref[...]                     # (L, BB)
    sel_bl = sel_bl_ref[...]                     # (BB, L)
    # Per-batch mean over the fold.  pos_pool_ref holds pos_pool - mean(pos_sp)
    # to undo the pre-added spatial embedding inside the mean.
    mean = jnp.dot(x, sel_lb, preferred_element_type=jnp.float32) * (1.0 / seq)
    pool_tok = mean + pos_pool_ref[...]          # (C, BB)
    out = _single_query_attention(x, pool_tok, wqkv_ref[...], bqkv_ref[...],
                                  wct_ref[...], bc_ref[...], sel_lb, sel_bl,
                                  heads, head_ch)
    o_ref[0, :, :] = out.astype(o_ref.dtype)     # (BB, O), lane-dense


def _single_kernel(x_ref, pos_sp_ref, pos_pool_ref,
                   wqkv_ref, bqkv_ref, wct_ref, bc_ref, o_ref,
                   *, heads, head_ch):
    """BB == 1: no batch fold (and no extra wrapper HBM pass over x)."""
    x = x_ref[0]                                 # (C, S) raw input tokens
    sp_tok = x + pos_sp_ref[...]                 # (C, S)
    pool_tok = jnp.mean(x, axis=-1, keepdims=True) + pos_pool_ref[...]  # (C, 1)
    out = _single_query_attention(sp_tok, pool_tok, wqkv_ref[...], bqkv_ref[...],
                                  wct_ref[...], bc_ref[...], None, None,
                                  heads, head_ch)
    o_ref[0, :, :] = out.astype(o_ref.dtype)     # (1, O), lane-dense


# ----------------------------------------------------------------------------
# Host-side sizing heuristics
# ----------------------------------------------------------------------------
def _vmem_limit_bytes():
    """Scoped-VMEM limit to request: ~3/4 of physical, conservative default."""
    try:
        cap = int(pltpu.get_tpu_info().vmem_capacity_bytes)
    except Exception:
        cap = 64 << 20                 # v7x per-TensorCore VMEM (smallest gen)
    return min((cap * 3) // 4, 96 << 20)


def _num_tensorcores():
    """TensorCores a 'parallel' grid axis can be split across on this chip."""
    try:
        kind = jax.devices()[0].device_kind.lower()
    except Exception:
        return 1
    return 2 if ("v7" in kind or "v4" in kind or "v5p" in kind) else 1


def _pick_block_batch(batch, seq, channels, out_ch, vmem_limit):
    """Batch elements folded onto the lane axis per grid step.

    Fold enough batch for lane-dense matmuls while (a) keeping ~10 live f32
    (C, L) activation slabs plus the resident weights inside about half the
    scoped VMEM (sized for v7x's smaller VMEM), and (b) keeping >= 2 grid
    steps only on chips with 2 TensorCores.
    """
    if batch <= 1 or seq >= 128:
        # Lane axis already dense per batch element (or nothing to fold):
        # skip the fold and its extra HBM pass over x.
        return 1
    weight_bytes = (3 * channels * channels + channels * out_ch) * 4
    budget = max(vmem_limit // 2 - 2 * weight_bytes, 40 * channels * seq)
    l_max = budget // (40 * channels)            # ~10 f32 slabs of (C, L)
    bb = int(max(min(l_max // seq, batch), 1))
    if _num_tensorcores() >= 2 and batch >= 2:
        bb = min(bb, max(batch // 2, 1))
    return bb


# ----------------------------------------------------------------------------
# Wrapper
# ----------------------------------------------------------------------------
def attention_pool2d_pallas(x, pos_emb, w_qkv, b_qkv, w_c, b_c, num_heads):
    """x: (B, C, H, W) NCHW.  Returns (B, output_dim) -- the pooled token only."""
    B, C, Hh, Ww = x.shape
    S = Hh * Ww
    O = w_c.shape[0]
    H = num_heads
    ch = C // H

    vmem_limit = _vmem_limit_bytes()
    BB = _pick_block_batch(B, S, C, O, vmem_limit)
    B_pad = pl.cdiv(B, BB) * BB                  # pad batch instead of shrinking BB
    G = B_pad // BB
    L = BB * S

    pos_pool = pos_emb[:, :1]                    # (C, 1)
    pos_sp = pos_emb[:, 1:]                      # (C, S)
    b_qkv2 = b_qkv.reshape(-1, 1)                # (3C, 1)
    w_c_t = w_c.T                                # (C, O): lane-dense c_proj output
    b_c_row = b_c.reshape(1, -1)                 # (1, O)

    def const_spec(shape, buffered):
        # Constant-index blocks stay resident across the grid; Buffered(1)
        # additionally drops their useless second (double-buffer) copy.
        idx = lambda g: (0,) * len(shape)
        if buffered:
            return pl.BlockSpec(shape, idx, pipeline_mode=pl.Buffered(1))
        return pl.BlockSpec(shape, idx)

    if BB == 1:
        x_in = x.reshape(B, C, S)                # layout-preserving, no HBM copy
        kernel = functools.partial(_single_kernel, heads=H, head_ch=ch)
        operands = (x_in, pos_sp, pos_pool, w_qkv, b_qkv2, w_c_t, b_c_row)

        def in_specs(buffered):
            return [
                pl.BlockSpec((1, C, S), lambda g: (g, 0, 0)),
                const_spec((C, S), buffered),
                const_spec((C, 1), buffered),
                const_spec((3 * C, C), buffered),
                const_spec((3 * C, 1), buffered),
                const_spec((C, O), buffered),
                const_spec((1, O), buffered),
            ]
    else:
        # Fold BB batch elements onto the lane axis; fuse the spatial pos-emb
        # add into the same (already materializing) pass, and pre-correct the
        # pooled-token embedding for the mean of what was added.
        x_p = x.reshape(B, C, S)
        if B_pad > B:
            x_p = jnp.concatenate(
                [x_p, jnp.zeros((B_pad - B, C, S), x.dtype)], axis=0)
        x_fold = (x_p.reshape(G, BB, C, S).transpose(0, 2, 1, 3).reshape(G, C, L)
                  + jnp.tile(pos_sp, (1, BB))[None].astype(x.dtype))
        pos_pool_adj = pos_pool - jnp.mean(pos_sp, axis=-1, keepdims=True)
        # 0/1 lane<->batch selection matrices, built once on the host.
        lane_batch = jnp.arange(L, dtype=jnp.int32) // S
        sel_lb = (lane_batch[:, None]
                  == jnp.arange(BB, dtype=jnp.int32)[None, :]).astype(jnp.float32)
        sel_bl = sel_lb.T

        kernel = functools.partial(_fold_kernel, seq=S, heads=H, head_ch=ch)
        operands = (x_fold, pos_pool_adj, sel_lb, sel_bl,
                    w_qkv, b_qkv2, w_c_t, b_c_row)

        def in_specs(buffered):
            return [
                pl.BlockSpec((1, C, L), lambda g: (g, 0, 0)),
                const_spec((C, 1), buffered),
                const_spec((L, BB), buffered),
                const_spec((BB, L), buffered),
                const_spec((3 * C, C), buffered),
                const_spec((3 * C, 1), buffered),
                const_spec((C, O), buffered),
                const_spec((1, O), buffered),
            ]

    out_shape = jax.ShapeDtypeStruct((G, BB, O), x.dtype)
    out_spec = pl.BlockSpec((1, BB, O), lambda g: (g, 0, 0))
    compiler_params = pltpu.CompilerParams(
        dimension_semantics=("parallel",), vmem_limit_bytes=vmem_limit)

    def call(buffered):
        return pl.pallas_call(
            kernel,
            out_shape=out_shape,
            grid=(G,),
            in_specs=in_specs(buffered),
            out_specs=out_spec,
            compiler_params=compiler_params,
        )(*operands)

    try:
        out = call(buffered=True)
    except Exception:
        # pipeline_mode=pl.Buffered(1) unsupported on this jax/libtpu build:
        # fall back to default (double-buffered) resident constant blocks.
        out = call(buffered=False)

    # (G, BB, O) -> (B, O): pure reshape (+ pad slice); no transpose needed.
    return out.reshape(B_pad, O)[:B]


# ----------------------------------------------------------------------------
# Pure-JAX reference (matches the PyTorch module exactly)
# ----------------------------------------------------------------------------
def attention_pool2d_ref(x, pos_emb, w_qkv, b_qkv, w_c, b_c, num_heads):
    B, C, Hh, Ww = x.shape
    xs = x.reshape(B, C, -1)
    xs = jnp.concatenate([xs.mean(-1, keepdims=True), xs], axis=-1)
    xs = xs + pos_emb[None]
    qkv = jnp.einsum("oc,bct->bot", w_qkv, xs) + b_qkv[None, :, None]
    T = xs.shape[-1]
    H = num_heads
    ch = C // H
    q, k, v = jnp.split(qkv, 3, axis=1)
    q = q.reshape(B * H, ch, T)
    k = k.reshape(B * H, ch, T)
    v = v.reshape(B * H, ch, T)
    scale = 1.0 / math.sqrt(math.sqrt(ch))
    w = jnp.einsum("bct,bcs->bts", q * scale, k * scale)
    w = jax.nn.softmax(w, axis=-1)
    a = jnp.einsum("bts,bcs->bct", w, v).reshape(B, C, T)
    out = jnp.einsum("oc,bct->bot", w_c, a) + b_c[None, :, None]
    return out[:, :, 0]


if __name__ == "__main__":
    # Module config: spacial_dim=4 (4x4 -> 16 spatial tokens + 1 pooled),
    # embed_dim=32, num_heads_channels=8 (-> 4 heads), output_dim=16.
    spacial_dim = 4
    embed_dim = 32
    num_heads_channels = 8
    output_dim = 16
    B = 2
    num_heads = embed_dim // num_heads_channels
    T = spacial_dim ** 2 + 1

    key = jax.random.PRNGKey(0)
    ks = jax.random.split(key, 6)

    x = jax.random.normal(ks[0], (B, embed_dim, spacial_dim, spacial_dim),
                          dtype=jnp.float32)
    # positional_embedding = randn(embed_dim, spacial_dim**2 + 1) / embed_dim**0.5
    pos_emb = jax.random.normal(ks[1], (embed_dim, T), jnp.float32) / embed_dim ** 0.5
    # qkv_proj: Conv1d(embed_dim, 3*embed_dim, 1) -> weight (3C, C, 1), bias (3C,)
    w_qkv = jax.random.normal(ks[2], (3 * embed_dim, embed_dim, 1), jnp.float32) * 0.05
    b_qkv = jax.random.normal(ks[3], (3 * embed_dim,), jnp.float32) * 0.05
    # c_proj: Conv1d(embed_dim, output_dim, 1) -> weight (O, C, 1), bias (O,)
    w_c = jax.random.normal(ks[4], (output_dim, embed_dim, 1), jnp.float32) * 0.05
    b_c = jax.random.normal(ks[5], (output_dim,), jnp.float32) * 0.05

    out = attention_pool2d_pallas(x, pos_emb, w_qkv[:, :, 0], b_qkv,
                                  w_c[:, :, 0], b_c, num_heads)
    out = jax.block_until_ready(out)

    ref = attention_pool2d_ref(x, pos_emb, w_qkv[:, :, 0], b_qkv,
                               w_c[:, :, 0], b_c, num_heads)
    assert out.shape == (B, output_dim), out.shape
    err = jnp.max(jnp.abs(out - ref))
    assert jnp.allclose(out, ref, atol=1e-4, rtol=1e-4), f"max abs err {err}"
    print("KERNEL_OK")
</pallas_src>

<mosaic_0001>
module attributes {stable_mosaic.version = 11 : i64} {
  func.func @_fold_kernel(%arg0: i32, %arg1: memref<1x32x32xf32, #tpu.memory_space<vmem>>, %arg2: memref<32x1xf32, #tpu.memory_space<vmem>>, %arg3: memref<32x2xf32, #tpu.memory_space<vmem>>, %arg4: memref<2x32xf32, #tpu.memory_space<vmem>>, %arg5: memref<96x32xf32, #tpu.memory_space<vmem>>, %arg6: memref<96x1xf32, #tpu.memory_space<vmem>>, %arg7: memref<32x16xf32, #tpu.memory_space<vmem>>, %arg8: memref<1x16xf32, #tpu.memory_space<vmem>>, %arg9: memref<1x2x16xf32, #tpu.memory_space<vmem>>) attributes {dimension_semantics = [#tpu.dimension_semantics<parallel>], iteration_bounds = array<i64: 1>, scalar_prefetch = 0 : i64, scratch_operands = 0 : i64, tpu.core_type = #tpu.core_type<tc>, window_params = [{transform_indices = @transform_0, window_bounds = array<i64: 1, 32, 32>}, {pipeline_mode = #tpu.pipeline_mode<synchronous>, transform_indices = @transform_1, window_bounds = array<i64: 32, 1>}, {pipeline_mode = #tpu.pipeline_mode<synchronous>, transform_indices = @transform_2, window_bounds = array<i64: 32, 2>}, {pipeline_mode = #tpu.pipeline_mode<synchronous>, transform_indices = @transform_3, window_bounds = array<i64: 2, 32>}, {pipeline_mode = #tpu.pipeline_mode<synchronous>, transform_indices = @transform_4, window_bounds = array<i64: 96, 32>}, {pipeline_mode = #tpu.pipeline_mode<synchronous>, transform_indices = @transform_5, window_bounds = array<i64: 96, 1>}, {pipeline_mode = #tpu.pipeline_mode<synchronous>, transform_indices = @transform_6, window_bounds = array<i64: 32, 16>}, {pipeline_mode = #tpu.pipeline_mode<synchronous>, transform_indices = @transform_7, window_bounds = array<i64: 1, 16>}, {transform_indices = @transform_8, window_bounds = array<i64: 1, 2, 16>}]} {
    %c0 = arith.constant 0 : index
    %c0_0 = arith.constant 0 : index
    %c0_1 = arith.constant 0 : index
    %0 = vector.load %arg1[%c0, %c0_0, %c0_1] : memref<1x32x32xf32, #tpu.memory_space<vmem>>, vector<1x32x32xf32>
    %1 = vector.shape_cast %0 : vector<1x32x32xf32> to vector<32x32xf32>
    %c0_2 = arith.constant 0 : index
    %c0_3 = arith.constant 0 : index
    %2 = vector.load %arg3[%c0_2, %c0_3] : memref<32x2xf32, #tpu.memory_space<vmem>>, vector<32x2xf32>
    %c0_4 = arith.constant 0 : index
    %c0_5 = arith.constant 0 : index
    %3 = vector.load %arg4[%c0_4, %c0_5] : memref<2x32xf32, #tpu.memory_space<vmem>>, vector<2x32xf32>
    %cst = arith.constant dense<0.000000e+00> : vector<32x2xf32>
    %4 = tpu.matmul %1, %2, %cst {dimension_numbers = #tpu.dot_dimension_numbers<[1], [0], [0], [1], [0, 0, 1, 1], [], []>} : vector<32x32xf32>, vector<32x2xf32>, vector<32x2xf32> -> vector<32x2xf32>
    %cst_6 = arith.constant 6.250000e-02 : f32
    %5 = vector.broadcast %cst_6 : f32 to vector<32x2xf32>
    %6 = arith.mulf %4, %5 : vector<32x2xf32>
    %c0_7 = arith.constant 0 : index
    %c0_8 = arith.constant 0 : index
    %7 = vector.load %arg2[%c0_7, %c0_8] : memref<32x1xf32, #tpu.memory_space<vmem>>, vector<32x1xf32>
    %8 = vector.broadcast %7 : vector<32x1xf32> to vector<32x2xf32>
    %9 = arith.addf %6, %8 : vector<32x2xf32>
    %c0_9 = arith.constant 0 : index
    %c0_10 = arith.constant 0 : index
    %10 = vector.load %arg5[%c0_9, %c0_10] : memref<96x32xf32, #tpu.memory_space<vmem>>, vector<96x32xf32>
    %c0_11 = arith.constant 0 : index
    %c0_12 = arith.constant 0 : index
    %11 = vector.load %arg6[%c0_11, %c0_12] : memref<96x1xf32, #tpu.memory_space<vmem>>, vector<96x1xf32>
    %c0_13 = arith.constant 0 : index
    %c0_14 = arith.constant 0 : index
    %12 = vector.load %arg7[%c0_13, %c0_14] : memref<32x16xf32, #tpu.memory_space<vmem>>, vector<32x16xf32>
    %c0_15 = arith.constant 0 : index
    %c0_16 = arith.constant 0 : index
    %13 = vector.load %arg8[%c0_15, %c0_16] : memref<1x16xf32, #tpu.memory_space<vmem>>, vector<1x16xf32>
    %cst_17 = arith.constant dense<0.000000e+00> : vector<96x32xf32>
    %14 = tpu.matmul %10, %1, %cst_17 {dimension_numbers = #tpu.dot_dimension_numbers<[1], [0], [0], [1], [0, 0, 1, 1], [], []>} : vector<96x32xf32>, vector<32x32xf32>, vector<96x32xf32> -> vector<96x32xf32>
    %15 = vector.broadcast %11 : vector<96x1xf32> to vector<96x32xf32>
    %16 = arith.addf %14, %15 : vector<96x32xf32>
    %cst_18 = arith.constant dense<0.000000e+00> : vector<96x2xf32>
    %17 = tpu.matmul %10, %9, %cst_18 {dimension_numbers = #tpu.dot_dimension_numbers<[1], [0], [0], [1], [0, 0, 1, 1], [], []>} : vector<96x32xf32>, vector<32x2xf32>, vector<96x2xf32> -> vector<96x2xf32>
    %18 = vector.broadcast %11 : vector<96x1xf32> to vector<96x2xf32>
    %19 = arith.addf %17, %18 : vector<96x2xf32>
    %20 = vector.extract_strided_slice %19 {offsets = [0, 0], sizes = [32, 2], strides = [1, 1]} : vector<96x2xf32> to vector<32x2xf32>
    %cst_19 = arith.constant 0.353553385 : f32
    %21 = vector.broadcast %cst_19 : f32 to vector<32x2xf32>
    %22 = arith.mulf %20, %21 : vector<32x2xf32>
    %23 = vector.extract_strided_slice %19 {offsets = [32, 0], sizes = [32, 2], strides = [1, 1]} : vector<96x2xf32> to vector<32x2xf32>
    %24 = vector.extract_strided_slice %19 {offsets = [64, 0], sizes = [32, 2], strides = [1, 1]} : vector<96x2xf32> to vector<32x2xf32>
    %25 = vector.extract_strided_slice %16 {offsets = [32, 0], sizes = [32, 32], strides = [1, 1]} : vector<96x32xf32> to vector<32x32xf32>
    %26 = vector.extract_strided_slice %16 {offsets = [64, 0], sizes = [32, 32], strides = [1, 1]} : vector<96x32xf32> to vector<32x32xf32>
    %cst_20 = arith.constant dense<0.000000e+00> : vector<32x32xf32>
    %27 = tpu.matmul %22, %3, %cst_20 {dimension_numbers = #tpu.dot_dimension_numbers<[1], [0], [0], [1], [0, 0, 1, 1], [], []>} : vector<32x2xf32>, vector<2x32xf32>, vector<32x32xf32> -> vector<32x32xf32>
    %28 = arith.mulf %27, %25 : vector<32x32xf32>
    %29 = vector.shape_cast %28 : vector<32x32xf32> to vector<4x8x32xf32>
    %cst_21 = arith.constant dense<0.000000e+00> : vector<4x32xf32>
    %30 = vector.multi_reduction <add>, %29, %cst_21 [1] : vector<4x8x32xf32> to vector<4x32xf32>
    %31 = arith.mulf %22, %23 : vector<32x2xf32>
    %32 = vector.shape_cast %31 : vector<32x2xf32> to vector<4x8x2xf32>
    %cst_22 = arith.constant dense<0.000000e+00> : vector<4x2xf32>
    %33 = vector.multi_reduction <add>, %32, %cst_22 [1] : vector<4x8x2xf32> to vector<4x2xf32>
    %cst_23 = arith.constant dense<0xFF800000> : vector<4xf32>
    %34 = vector.multi_reduction <maximumf>, %30, %cst_23 [1] : vector<4x32xf32> to vector<4xf32>
    %35 = vector.shape_cast %34 : vector<4xf32> to vector<4x1xf32>
    %cst_24 = arith.constant dense<0xFF800000> : vector<4xf32>
    %36 = vector.multi_reduction <maximumf>, %33, %cst_24 [1] : vector<4x2xf32> to vector<4xf32>
    %37 = vector.shape_cast %36 : vector<4xf32> to vector<4x1xf32>
    %38 = arith.maximumf %35, %37 : vector<4x1xf32>
    %39 = vector.broadcast %38 : vector<4x1xf32> to vector<4x32xf32>
    %40 = arith.subf %30, %39 : vector<4x32xf32>
    %41 = math.exp %40 : vector<4x32xf32>
    %42 = vector.broadcast %38 : vector<4x1xf32> to vector<4x2xf32>
    %43 = arith.subf %33, %42 : vector<4x2xf32>
    %44 = math.exp %43 : vector<4x2xf32>
    %cst_25 = arith.constant dense<0.000000e+00> : vector<4x2xf32>
    %45 = tpu.matmul %41, %2, %cst_25 {dimension_numbers = #tpu.dot_dimension_numbers<[1], [0], [0], [1], [0, 0, 1, 1], [], []>} : vector<4x32xf32>, vector<32x2xf32>, vector<4x2xf32> -> vector<4x2xf32>
    %46 = arith.addf %44, %45 : vector<4x2xf32>
    %47 = tpu.reciprocal %46 : vector<4x2xf32> -> vector<4x2xf32>
    %48 = vector.shape_cast %26 : vector<32x32xf32> to vector<4x8x32xf32>
    %49 = vector.shape_cast %41 : vector<4x32xf32> to vector<4x1x32xf32>
    %50 = vector.broadcast %49 : vector<4x1x32xf32> to vector<4x8x32xf32>
    %51 = arith.mulf %48, %50 : vector<4x8x32xf32>
    %52 = vector.shape_cast %51 : vector<4x8x32xf32> to vector<32x32xf32>
    %cst_26 = arith.constant dense<0.000000e+00> : vector<32x2xf32>
    %53 = tpu.matmul %52, %2, %cst_26 {dimension_numbers = #tpu.dot_dimension_numbers<[1], [0], [0], [1], [0, 0, 1, 1], [], []>} : vector<32x32xf32>, vector<32x2xf32>, vector<32x2xf32> -> vector<32x2xf32>
    %54 = vector.shape_cast %24 : vector<32x2xf32> to vector<4x8x2xf32>
    %55 = vector.shape_cast %44 : vector<4x2xf32> to vector<4x1x2xf32>
    %56 = vector.broadcast %55 : vector<4x1x2xf32> to vector<4x8x2xf32>
    %57 = arith.mulf %54, %56 : vector<4x8x2xf32>
    %58 = vector.shape_cast %57 : vector<4x8x2xf32> to vector<32x2xf32>
    %59 = arith.addf %53, %58 : vector<32x2xf32>
    %60 = vector.shape_cast %59 : vector<32x2xf32> to vector<4x8x2xf32>
    %61 = vector.shape_cast %47 : vector<4x2xf32> to vector<4x1x2xf32>
    %62 = vector.broadcast %61 : vector<4x1x2xf32> to vector<4x8x2xf32>
    %63 = arith.mulf %60, %62 : vector<4x8x2xf32>
    %64 = vector.shape_cast %63 : vector<4x8x2xf32> to vector<32x2xf32>
    %65 = tpu.transpose %64, [1, 0] : vector<32x2xf32> -> vector<2x32xf32>
    %cst_27 = arith.constant dense<0.000000e+00> : vector<2x16xf32>
    %66 = tpu.matmul %65, %12, %cst_27 {dimension_numbers = #tpu.dot_dimension_numbers<[1], [0], [0], [1], [0, 0, 1, 1], [], []>} : vector<2x32xf32>, vector<32x16xf32>, vector<2x16xf32> -> vector<2x16xf32>
    %67 = vector.broadcast %13 : vector<1x16xf32> to vector<2x16xf32>
    %68 = arith.addf %66, %67 : vector<2x16xf32>
    %c0_28 = arith.constant 0 : index
    %c0_29 = arith.constant 0 : index
    %c0_30 = arith.constant 0 : index
    %69 = vector.load %arg9[%c0_28, %c0_29, %c0_30] : memref<1x2x16xf32, #tpu.memory_space<vmem>>, vector<1x2x16xf32>
    %70 = vector.shape_cast %69 : vector<1x2x16xf32> to vector<2x16xf32>
    %71 = vector.shape_cast %68 : vector<2x16xf32> to vector<1x2x16xf32>
    tpu.vector_store %arg9[%c0_28, %c0_29, %c0_30], %71 {strides = array<i32>} : memref<1x2x16xf32, #tpu.memory_space<vmem>>, vector<1x2x16xf32>,
    return
  }
  func.func @transform_0(%arg0: i32) -> (i32, i32, i32) {
    %c0_i32 = arith.constant 0 : i32
    %c0_i32_0 = arith.constant 0 : i32
    %c0_i32_1 = arith.constant 0 : i32
    return %arg0, %c0_i32, %c0_i32_0 : i32, i32, i32
  }
  func.func @transform_1(%arg0: i32) -> (i32, i32) {
    %c0_i32 = arith.constant 0 : i32
    %c0_i32_0 = arith.constant 0 : i32
    %c0_i32_1 = arith.constant 0 : i32
    return %c0_i32, %c0_i32_0 : i32, i32
  }
  func.func @transform_2(%arg0: i32) -> (i32, i32) {
    %c0_i32 = arith.constant 0 : i32
    %c0_i32_0 = arith.constant 0 : i32
    %c0_i32_1 = arith.constant 0 : i32
    return %c0_i32, %c0_i32_0 : i32, i32
  }
  func.func @transform_3(%arg0: i32) -> (i32, i32) {
    %c0_i32 = arith.constant 0 : i32
    %c0_i32_0 = arith.constant 0 : i32
    %c0_i32_1 = arith.constant 0 : i32
    return %c0_i32, %c0_i32_0 : i32, i32
  }
  func.func @transform_4(%arg0: i32) -> (i32, i32) {
    %c0_i32 = arith.constant 0 : i32
    %c0_i32_0 = arith.constant 0 : i32
    %c0_i32_1 = arith.constant 0 : i32
    return %c0_i32, %c0_i32_0 : i32, i32
  }
  func.func @transform_5(%arg0: i32) -> (i32, i32) {
    %c0_i32 = arith.constant 0 : i32
    %c0_i32_0 = arith.constant 0 : i32
    %c0_i32_1 = arith.constant 0 : i32
    return %c0_i32, %c0_i32_0 : i32, i32
  }
  func.func @transform_6(%arg0: i32) -> (i32, i32) {
    %c0_i32 = arith.constant 0 : i32
    %c0_i32_0 = arith.constant 0 : i32
    %c0_i32_1 = arith.constant 0 : i32
    return %c0_i32, %c0_i32_0 : i32, i32
  }
  func.func @transform_7(%arg0: i32) -> (i32, i32) {
    %c0_i32 = arith.constant 0 : i32
    %c0_i32_0 = arith.constant 0 : i32
    %c0_i32_1 = arith.constant 0 : i32
    return %c0_i32, %c0_i32_0 : i32, i32
  }
  func.func @transform_8(%arg0: i32) -> (i32, i32, i32) {
    %c0_i32 = arith.constant 0 : i32
    %c0_i32_0 = arith.constant 0 : i32
    %c0_i32_1 = arith.constant 0 : i32
    return %arg0, %c0_i32, %c0_i32_0 : i32, i32, i32
  }
}

module attributes {stable_mosaic.version = 11 : i64} {
  func.func @_fold_kernel(%arg0: i32, %arg1: memref<1x32x32xf32, #tpu.memory_space<vmem>>, %arg2: memref<32x1xf32, #tpu.memory_space<vmem>>, %arg3: memref<32x2xf32, #tpu.memory_space<vmem>>, %arg4: memref<2x32xf32, #tpu.memory_space<vmem>>, %arg5: memref<96x32xf32, #tpu.memory_space<vmem>>, %arg6: memref<96x1xf32, #tpu.memory_space<vmem>>, %arg7: memref<32x16xf32, #tpu.memory_space<vmem>>, %arg8: memref<1x16xf32, #tpu.memory_space<vmem>>, %arg9: memref<1x2x16xf32, #tpu.memory_space<vmem>>) attributes {dimension_semantics = [#tpu.dimension_semantics<parallel>], iteration_bounds = array<i64: 1>, scalar_prefetch = 0 : i64, scratch_operands = 0 : i64, tpu.core_type = #tpu.core_type<tc>, window_params = [{transform_indices = @transform_0, window_bounds = array<i64: 1, 32, 32>}, {pipeline_mode = #tpu.pipeline_mode<synchronous>, transform_indices = @transform_1, window_bounds = array<i64: 32, 1>}, {pipeline_mode = #tpu.pipeline_mode<synchronous>, transform_indices = @transform_2, window_bounds = array<i64: 32, 2>}, {pipeline_mode = #tpu.pipeline_mode<synchronous>, transform_indices = @transform_3, window_bounds = array<i64: 2, 32>}, {pipeline_mode = #tpu.pipeline_mode<synchronous>, transform_indices = @transform_4, window_bounds = array<i64: 96, 32>}, {pipeline_mode = #tpu.pipeline_mode<synchronous>, transform_indices = @transform_5, window_bounds = array<i64: 96, 1>}, {pipeline_mode = #tpu.pipeline_mode<synchronous>, transform_indices = @transform_6, window_bounds = array<i64: 32, 16>}, {pipeline_mode = #tpu.pipeline_mode<synchronous>, transform_indices = @transform_7, window_bounds = array<i64: 1, 16>}, {transform_indices = @transform_8, window_bounds = array<i64: 1, 2, 16>}]} {
    %c0 = arith.constant 0 : index
    %c0_0 = arith.constant 0 : index
    %c0_1 = arith.constant 0 : index
    %0 = vector.load %arg1[%c0, %c0_0, %c0_1] : memref<1x32x32xf32, #tpu.memory_space<vmem>>, vector<1x32x32xf32>
    %1 = vector.shape_cast %0 : vector<1x32x32xf32> to vector<32x32xf32>
    %c0_2 = arith.constant 0 : index
    %c0_3 = arith.constant 0 : index
    %2 = vector.load %arg3[%c0_2, %c0_3] : memref<32x2xf32, #tpu.memory_space<vmem>>, vector<32x2xf32>
    %c0_4 = arith.constant 0 : index
    %c0_5 = arith.constant 0 : index
    %3 = vector.load %arg4[%c0_4, %c0_5] : memref<2x32xf32, #tpu.memory_space<vmem>>, vector<2x32xf32>
    %cst = arith.constant dense<0.000000e+00> : vector<32x2xf32>
    %4 = tpu.matmul %1, %2, %cst {dimension_numbers = #tpu.dot_dimension_numbers<[1], [0], [0], [1], [0, 0, 1, 1], [], []>} : vector<32x32xf32>, vector<32x2xf32>, vector<32x2xf32> -> vector<32x2xf32>
    %cst_6 = arith.constant 6.250000e-02 : f32
    %5 = vector.broadcast %cst_6 : f32 to vector<32x2xf32>
    %6 = arith.mulf %4, %5 : vector<32x2xf32>
    %c0_7 = arith.constant 0 : index
    %c0_8 = arith.constant 0 : index
    %7 = vector.load %arg2[%c0_7, %c0_8] : memref<32x1xf32, #tpu.memory_space<vmem>>, vector<32x1xf32>
    %8 = vector.broadcast %7 : vector<32x1xf32> to vector<32x2xf32>
    %9 = arith.addf %6, %8 : vector<32x2xf32>
    %c0_9 = arith.constant 0 : index
    %c0_10 = arith.constant 0 : index
    %10 = vector.load %arg5[%c0_9, %c0_10] : memref<96x32xf32, #tpu.memory_space<vmem>>, vector<96x32xf32>
    %c0_11 = arith.constant 0 : index
    %c0_12 = arith.constant 0 : index
    %11 = vector.load %arg6[%c0_11, %c0_12] : memref<96x1xf32, #tpu.memory_space<vmem>>, vector<96x1xf32>
    %c0_13 = arith.constant 0 : index
    %c0_14 = arith.constant 0 : index
    %12 = vector.load %arg7[%c0_13, %c0_14] : memref<32x16xf32, #tpu.memory_space<vmem>>, vector<32x16xf32>
    %c0_15 = arith.constant 0 : index
    %c0_16 = arith.constant 0 : index
    %13 = vector.load %arg8[%c0_15, %c0_16] : memref<1x16xf32, #tpu.memory_space<vmem>>, vector<1x16xf32>
    %cst_17 = arith.constant dense<0.000000e+00> : vector<96x32xf32>
    %14 = tpu.matmul %10, %1, %cst_17 {dimension_numbers = #tpu.dot_dimension_numbers<[1], [0], [0], [1], [0, 0, 1, 1], [], []>} : vector<96x32xf32>, vector<32x32xf32>, vector<96x32xf32> -> vector<96x32xf32>
    %15 = vector.broadcast %11 : vector<96x1xf32> to vector<96x32xf32>
    %16 = arith.addf %14, %15 : vector<96x32xf32>
    %cst_18 = arith.constant dense<0.000000e+00> : vector<96x2xf32>
    %17 = tpu.matmul %10, %9, %cst_18 {dimension_numbers = #tpu.dot_dimension_numbers<[1], [0], [0], [1], [0, 0, 1, 1], [], []>} : vector<96x32xf32>, vector<32x2xf32>, vector<96x2xf32> -> vector<96x2xf32>
    %18 = vector.broadcast %11 : vector<96x1xf32> to vector<96x2xf32>
    %19 = arith.addf %17, %18 : vector<96x2xf32>
    %20 = vector.extract_strided_slice %19 {offsets = [0, 0], sizes = [32, 2], strides = [1, 1]} : vector<96x2xf32> to vector<32x2xf32>
    %cst_19 = arith.constant 0.353553385 : f32
    %21 = vector.broadcast %cst_19 : f32 to vector<32x2xf32>
    %22 = arith.mulf %20, %21 : vector<32x2xf32>
    %23 = vector.extract_strided_slice %19 {offsets = [32, 0], sizes = [32, 2], strides = [1, 1]} : vector<96x2xf32> to vector<32x2xf32>
    %24 = vector.extract_strided_slice %19 {offsets = [64, 0], sizes = [32, 2], strides = [1, 1]} : vector<96x2xf32> to vector<32x2xf32>
    %25 = vector.extract_strided_slice %16 {offsets = [32, 0], sizes = [32, 32], strides = [1, 1]} : vector<96x32xf32> to vector<32x32xf32>
    %26 = vector.extract_strided_slice %16 {offsets = [64, 0], sizes = [32, 32], strides = [1, 1]} : vector<96x32xf32> to vector<32x32xf32>
    %cst_20 = arith.constant dense<0.000000e+00> : vector<32x32xf32>
    %27 = tpu.matmul %22, %3, %cst_20 {dimension_numbers = #tpu.dot_dimension_numbers<[1], [0], [0], [1], [0, 0, 1, 1], [], []>} : vector<32x2xf32>, vector<2x32xf32>, vector<32x32xf32> -> vector<32x32xf32>
    %28 = arith.mulf %27, %25 : vector<32x32xf32>
    %29 = vector.shape_cast %28 : vector<32x32xf32> to vector<4x8x32xf32>
    %cst_21 = arith.constant dense<0.000000e+00> : vector<4x32xf32>
    %30 = vector.multi_reduction <add>, %29, %cst_21 [1] : vector<4x8x32xf32> to vector<4x32xf32>
    %31 = arith.mulf %22, %23 : vector<32x2xf32>
    %32 = vector.shape_cast %31 : vector<32x2xf32> to vector<4x8x2xf32>
    %cst_22 = arith.constant dense<0.000000e+00> : vector<4x2xf32>
    %33 = vector.multi_reduction <add>, %32, %cst_22 [1] : vector<4x8x2xf32> to vector<4x2xf32>
    %cst_23 = arith.constant dense<0xFF800000> : vector<4xf32>
    %34 = vector.multi_reduction <maximumf>, %30, %cst_23 [1] : vector<4x32xf32> to vector<4xf32>
    %35 = vector.shape_cast %34 : vector<4xf32> to vector<4x1xf32>
    %cst_24 = arith.constant dense<0xFF800000> : vector<4xf32>
    %36 = vector.multi_reduction <maximumf>, %33, %cst_24 [1] : vector<4x2xf32> to vector<4xf32>
    %37 = vector.shape_cast %36 : vector<4xf32> to vector<4x1xf32>
    %38 = arith.maximumf %35, %37 : vector<4x1xf32>
    %39 = vector.broadcast %38 : vector<4x1xf32> to vector<4x32xf32>
    %40 = arith.subf %30, %39 : vector<4x32xf32>
    %41 = math.exp %40 : vector<4x32xf32>
    %42 = vector.broadcast %38 : vector<4x1xf32> to vector<4x2xf32>
    %43 = arith.subf %33, %42 : vector<4x2xf32>
    %44 = math.exp %43 : vector<4x2xf32>
    %cst_25 = arith.constant dense<0.000000e+00> : vector<4x2xf32>
    %45 = tpu.matmul %41, %2, %cst_25 {dimension_numbers = #tpu.dot_dimension_numbers<[1], [0], [0], [1], [0, 0, 1, 1], [], []>} : vector<4x32xf32>, vector<32x2xf32>, vector<4x2xf32> -> vector<4x2xf32>
    %46 = arith.addf %44, %45 : vector<4x2xf32>
    %47 = tpu.reciprocal %46 : vector<4x2xf32> -> vector<4x2xf32>
    %48 = vector.shape_cast %26 : vector<32x32xf32> to vector<4x8x32xf32>
    %49 = vector.shape_cast %41 : vector<4x32xf32> to vector<4x1x32xf32>
    %50 = vector.broadcast %49 : vector<4x1x32xf32> to vector<4x8x32xf32>
    %51 = arith.mulf %48, %50 : vector<4x8x32xf32>
    %52 = vector.shape_cast %51 : vector<4x8x32xf32> to vector<32x32xf32>
    %cst_26 = arith.constant dense<0.000000e+00> : vector<32x2xf32>
    %53 = tpu.matmul %52, %2, %cst_26 {dimension_numbers = #tpu.dot_dimension_numbers<[1], [0], [0], [1], [0, 0, 1, 1], [], []>} : vector<32x32xf32>, vector<32x2xf32>, vector<32x2xf32> -> vector<32x2xf32>
    %54 = vector.shape_cast %24 : vector<32x2xf32> to vector<4x8x2xf32>
    %55 = vector.shape_cast %44 : vector<4x2xf32> to vector<4x1x2xf32>
    %56 = vector.broadcast %55 : vector<4x1x2xf32> to vector<4x8x2xf32>
    %57 = arith.mulf %54, %56 : vector<4x8x2xf32>
    %58 = vector.shape_cast %57 : vector<4x8x2xf32> to vector<32x2xf32>
    %59 = arith.addf %53, %58 : vector<32x2xf32>
    %60 = vector.shape_cast %59 : vector<32x2xf32> to vector<4x8x2xf32>
    %61 = vector.shape_cast %47 : vector<4x2xf32> to vector<4x1x2xf32>
    %62 = vector.broadcast %61 : vector<4x1x2xf32> to vector<4x8x2xf32>
    %63 = arith.mulf %60, %62 : vector<4x8x2xf32>
    %64 = vector.shape_cast %63 : vector<4x8x2xf32> to vector<32x2xf32>
    %65 = tpu.transpose %64, [1, 0] : vector<32x2xf32> -> vector<2x32xf32>
    %cst_27 = arith.constant dense<0.000000e+00> : vector<2x16xf32>
    %66 = tpu.matmul %65, %12, %cst_27 {dimension_numbers = #tpu.dot_dimension_numbers<[1], [0], [0], [1], [0, 0, 1, 1], [], []>} : vector<2x32xf32>, vector<32x16xf32>, vector<2x16xf32> -> vector<2x16xf32>
    %67 = vector.broadcast %13 : vector<1x16xf32> to vector<2x16xf32>
    %68 = arith.addf %66, %67 : vector<2x16xf32>
    %c0_28 = arith.constant 0 : index
    %c0_29 = arith.constant 0 : index
    %c0_30 = arith.constant 0 : index
    %69 = vector.load %arg9[%c0_28, %c0_29, %c0_30] : memref<1x2x16xf32, #tpu.memory_space<vmem>>, vector<1x2x16xf32>
    %70 = vector.shape_cast %69 : vector<1x2x16xf32> to vector<2x16xf32>
    %71 = vector.shape_cast %68 : vector<2x16xf32> to vector<1x2x16xf32>
    tpu.vector_store %arg9[%c0_28, %c0_29, %c0_30], %71 {strides = array<i32>} : memref<1x2x16xf32, #tpu.memory_space<vmem>>, vector<1x2x16xf32>,
    return
  }
  func.func @transform_0(%arg0: i32) -> (i32, i32, i32) {
    %c0_i32 = arith.constant 0 : i32
    %c0_i32_0 = arith.constant 0 : i32
    %c0_i32_1 = arith.constant 0 : i32
    return %arg0, %c0_i32, %c0_i32_0 : i32, i32, i32
  }
  func.func @transform_1(%arg0: i32) -> (i32, i32) {
    %c0_i32 = arith.constant 0 : i32
    %c0_i32_0 = arith.constant 0 : i32
    %c0_i32_1 = arith.constant 0 : i32
    return %c0_i32, %c0_i32_0 : i32, i32
  }
  func.func @transform_2(%arg0: i32) -> (i32, i32) {
    %c0_i32 = arith.constant 0 : i32
    %c0_i32_0 = arith.constant 0 : i32
    %c0_i32_1 = arith.constant 0 : i32
    return %c0_i32, %c0_i32_0 : i32, i32
  }
  func.func @transform_3(%arg0: i32) -> (i32, i32) {
    %c0_i32 = arith.constant 0 : i32
    %c0_i32_0 = arith.constant 0 : i32
    %c0_i32_1 = arith.constant 0 : i32
    return %c0_i32, %c0_i32_0 : i32, i32
  }
  func.func @transform_4(%arg0: i32) -> (i32, i32) {
    %c0_i32 = arith.constant 0 : i32
    %c0_i32_0 = arith.constant 0 : i32
    %c0_i32_1 = arith.constant 0 : i32
    return %c0_i32, %c0_i32_0 : i32, i32
  }
  func.func @transform_5(%arg0: i32) -> (i32, i32) {
    %c0_i32 = arith.constant 0 : i32
    %c0_i32_0 = arith.constant 0 : i32
    %c0_i32_1 = arith.constant 0 : i32
    return %c0_i32, %c0_i32_0 : i32, i32
  }
  func.func @transform_6(%arg0: i32) -> (i32, i32) {
    %c0_i32 = arith.constant 0 : i32
    %c0_i32_0 = arith.constant 0 : i32
    %c0_i32_1 = arith.constant 0 : i32
    return %c0_i32, %c0_i32_0 : i32, i32
  }
  func.func @transform_7(%arg0: i32) -> (i32, i32) {
    %c0_i32 = arith.constant 0 : i32
    %c0_i32_0 = arith.constant 0 : i32
    %c0_i32_1 = arith.constant 0 : i32
    return %c0_i32, %c0_i32_0 : i32, i32
  }
  func.func @transform_8(%arg0: i32) -> (i32, i32, i32) {
    %c0_i32 = arith.constant 0 : i32
    %c0_i32_0 = arith.constant 0 : i32
    %c0_i32_1 = arith.constant 0 : i32
    return %arg0, %c0_i32, %c0_i32_0 : i32, i32, i32
  }
}

</mosaic_0001>

<bundles_post_ra>
// kernel: tpu_custom_call.1
= control target key start
LH: loop header
LB: loop body
LE: loop exit
PB: predicated region body
PF: predicated region fallthrough
CT: control target
= control target key end

     0   :  { %vm39_vm0 = vcmask 261120   ;;  %v1464_v7 = vmov 0   ;;  %s1846_s0 = inlined_call_operand.vmem [shape: f32[1,32,32], index: 0, kind: input, shape index: {}]   ;;  %s1847_s1 = inlined_call_operand.vmem [shape: f32[32,1], index: 1, kind: input, shape index: {}]   ;;  %s1848_s2 = inlined_call_operand.vmem [shape: f32[32,2], index: 2, kind: input, shape index: {}]   ;;  %s1849_s3 = inlined_call_operand.vmem [shape: f32[2,32], index: 3, kind: input, shape index: {}]   ;;  %s1850_s4 = inlined_call_operand.vmem [shape: f32[96,32], index: 4, kind: input, shape index: {}]   ;;  %s1851_s5 = inlined_call_operand.vmem [shape: f32[96,1], index: 5, kind: input, shape index: {}]   ;;  %s1852_s6 = inlined_call_operand.vmem [shape: f32[32,16], index: 6, kind: input, shape index: {}]   ;;  %s1853_s7 = inlined_call_operand.vmem [shape: f32[1,16], index: 7, kind: input, shape index: {}]   ;;  %s1854_s8 = inlined_call_operand.hbm [shape: f32[1,2,16], index: 8, kind: output, shape index: {}]  }
   0x1   :  { %v34_v0 = vld [vmem:[%s1848_s2] sm:$0xff]  ;;  %v35_v1 = vld [vmem:[%s1848_s2 + $0x8] sm:$0xff]  ;;  %v36_v5 = vld [vmem:[%s1848_s2 + $0x10] sm:$0xff]  ;;  %1414 = vset.pattern.permute.xlu0 %v1464_v7  ;;  %1415 = vset.pattern.permute.xlu1 %v1464_v7 }
   0x2   :  { %v30_v2 = vld [vmem:[%s1846_s0] sm:$0xff]  ;;  %v1523_v3 = vpack.c.bf16 %v35_v1, %v34_v0  ;;  %v31_v4 = vld [vmem:[%s1846_s0 + $0x8] sm:$0xff]  ;;  %v37_v6 = vld [vmem:[%s1848_s2 + $0x18] sm:$0xff] }
   0x3   :  { %1263 = vmatprep.mubr.msk.f32.mxu0 %vm39_vm0, %v30_v2  ;;  %v1373_v8 = vpack.c.bf16 %v31_v4, %v30_v2  ;;  %v1535_v9 = vpack.c.bf16 %v37_v6, %v36_v5  ;;  %v32_v10 = vld [vmem:[%s1846_s0 + $0x10] sm:$0xff]  ;;  %v33_v11 = vld [vmem:[%s1846_s0 + $0x18] sm:$0xff]  ;;  %v169_v12 = vld [vmem:[%s1850_s4] sm:$0xff] }
   0x4   :  { %1366 = vmatprep.subr.bf16.mxu0 %v1523_v3  ;;  %v1377_v13 = vpack.c.bf16 %v33_v11, %v32_v10  ;;  %1277 = vmatprep.mubr.msk.f32.mxu1 %vm39_vm0, %v169_v12  ;;  %v141_v14 = vld [vmem:[%s1847_s1] sm:$0xff]  ;;  %v143_v15 = vld [vmem:[%s1847_s1 + $0x10] sm:$0xff]  ;;  %v142_v16 = vld [vmem:[%s1847_s1 + $0x8] sm:$0xff] }
   0x5   :  { %1374 = vmatprep.subr.bf16.mxu1 %v1373_v8  ;;  %1368 = vmatpush3.bf16.msra.mxu0 %v1523_v3  ;;  %v144_v17 = vld [vmem:[%s1847_s1 + $0x18] sm:$0xff]  ;;  %v1566_v18 = vld [vmem:[%s1850_s4 + $0x8] sm:$0xff] }
   0x6   :  { %1376 = vmatpush3.bf16.msra.mxu1 %v1373_v8  ;;  %1370 = vmatprep.subr.bf16.mxu0 %v1535_v9 }
   0x7   :  { %1378 = vmatprep.subr.bf16.mxu1 %v1377_v13  ;;  %147 = vperm.xlu0 %1414, %v141_v14  }
   0x8   :  { %157 = vperm.xlu1 %1415, %v143_v15  }
   0x9   :  { %1372 = vmatpush3.bf16.msra.mxu0 %v1535_v9 }
   0xa   :  { %1380 = vmatpush3.bf16.msra.mxu1 %v1377_v13 }
   0xb   :  { %13 = vsyncpa [#allocation3], 0  ;;  %v1571_v19 = vld [vmem:[%s1850_s4 + $0x10] sm:$0xff]  ;;  %152 = vperm.xlu0 %1414, %v142_v16   ;;  %v181_v20 = vld [vmem:[%s1851_s5] sm:$0xff]  ;;  %vm557_vm1 = vcmask 1041408   ;;  %vm544_vm2 = vcmask 15360  }
   0xc   :  { %1264 = vmatmul.mubr.msk.f32.vlgmr.msra.gmra.mrb[0].mxu0 %vm39_vm0, %v31_v4  ;;  %162 = vperm.xlu1 %1415, %v144_v17   ;;  %v182_v21 = vld [vmem:[%s1851_s5 + $0x8] sm:$0xff]  ;;  %v1588_v22 = vld [vmem:[%s1850_s4 + $0x18] sm:$0xff]  ;;  %v1593_v23 = vld [vmem:[%s1850_s4 + $0x20] sm:$0xff]  ;;  %vm714_vm3 = vcmask 1041409   ;;  %vm716_vm4 = vcmask 1042434   ;;  %vm718_vm5 = vcmask 1043459  }
   0xd   :  { %1278 = vmatmul.mubr.msk.f32.vlgmr.msra.gmra.mrb[0].mxu1 %vm39_vm0, %v1566_v18  ;;  %1266 = vmatprep.mubr.msk.f32.mxu0 %vm39_vm0, %v32_v10  ;;  %v183_v24 = vld [vmem:[%s1851_s5 + $0x10] sm:$0xff]  ;;  %v184_v25 = vld [vmem:[%s1851_s5 + $0x18] sm:$0xff]  ;;  %v1610_v26 = vld [vmem:[%s1850_s4 + $0x28] sm:$0xff]  ;;  %vm733_vm6 = vcmask 11264   ;;  %vm721_vm7 = vcmask 257024   ;;  %vm1466_vm8 = vmmov 0  }
   0xe   :  { %1280 = vmatprep.mubr.msk.f32.mxu1 %vm39_vm0, %v1571_v19  ;;  %v1615_v27 = vld [vmem:[%s1850_s4 + $0x30] sm:$0xff]  ;;  %v185_v28 = vld [vmem:[%s1851_s5 + $0x20] sm:$0xff]  ;;  %v186_v29 = vld [vmem:[%s1851_s5 + $0x28] sm:$0xff]  ;;  %s1468_s11 = smov [#allocation2]   ;;  %vm1136_vm9 = vcmask 123904  }
   0xf   :  { %200 = vperm.xlu0 %1414, %v181_v20   ;;  %v176_v30 = vld [vmem:[%s1850_s4 + $0x38] sm:$0xff]  ;;  %v187_v31 = vld [vmem:[%s1851_s5 + $0x30] sm:$0xff]  ;;  %v177_v33 = vld [vmem:[%s1850_s4 + $0x40] sm:$0xff]  ;;  %s1144_s12 = sshll.u32 %s1468_s11, 4  ;;  %s1145_s12 = int_to_ptr.vmem [resolvable:$true] %s1144_s12 }
  0x10   :  { %1267 = vmatmul.mubr.msk.f32.gmra.mrb[2].mxu0 %vm39_vm0, %v33_v11  ;;  %205 = vperm.xlu1 %1415, %v182_v21   ;;  %v188_v32 = vld [vmem:[%s1851_s5 + $0x38] sm:$0xff]  ;;  %v178_v34 = vld [vmem:[%s1850_s4 + $0x48] sm:$0xff]  ;;  %v179_v35 = vld [vmem:[%s1850_s4 + $0x50] sm:$0xff]  ;;  %s1440_s1 = scalar_lea.vmem %s1145_s12, 32  ;;  %p1445_p1 = scmp.lt.s32.totalorder %s1145_s12, %s1145_s12 }
  0x11   :  { %1281 = vmatmul.mubr.msk.f32.gmra.mrb[2].mxu1 %vm39_vm0, %v1588_v22  ;;  %1303 = vmatprep.mubr.msk.f32.mxu0 %vm39_vm0, %v169_v12  ;;  %v180_v36 = vld [vmem:[%s1850_s4 + $0x58] sm:$0xff]  ;;  %v38_v37 = vld [vmem:[%s1849_s3] sm:$0x3]  ;;  %p1441_p0 = scmp.ne.s32.totalorder %s1145_s12, %s1440_s1  ;;  %p1446_p2 = scmp.lt.s32.totalorder %s1440_s1, %s1440_s1 }
  0x12   :  { %1283 = vmatprep.mubr.msk.f32.mxu1 %vm39_vm0, %v1593_v23  ;;  %1321 = vmatprep.subr.msk.mxu1 %vm557_vm1, %v38_v37 }
  0x13   :  { %210 = vperm.xlu0 %1414, %v183_v24   ;;  %1322 = vmatpush3.msk.msra.mxu1 %vm557_vm1, %v38_v37  ;;  %p1447_p3 = por %p1446_p2, %p1445_p1 }
  0x14   :  { %215 = vperm.xlu1 %1415, %v184_v25   ;;  %1396 = vmatprep.subr.bf16.mxu1 %v1523_v3 }
  0x15   :  { %1284 = vmatmul.mubr.msk.f32.gmra.mrb[4].mxu1 %vm39_vm0, %v1610_v26  ;;  %p1448_p4 = pnand %p1447_p3, %p1441_p0 }
  0x16   :  { %1286 = vmatprep.mubr.msk.f32.mxu1 %vm39_vm0, %v1615_v27 }
  0x17   :  { %220 = vperm.xlu0 %1414, %v185_v28  }
  0x18   :  { %225 = vperm.xlu1 %1415, %v186_v29  }
  0x19   :  { %1287 = vmatmul.mubr.msk.f32.gmra.mrb[6].mxu1 %vm39_vm0, %v176_v30 }
  0x1a   :  { %1289 = vmatprep.mubr.msk.f32.mxu1 %vm39_vm0, %v177_v33 }
  0x1b   :  { %230 = vperm.xlu0 %1414, %v187_v31  }
  0x1c   :  { %235 = vperm.xlu1 %1415, %v188_v32  }
  0x1d   :  { %1290 = vmatmul.mubr.msk.f32.gmra.mrb[8].mxu1 %vm39_vm0, %v178_v34 }
  0x1e   :  { %1292 = vmatprep.mubr.msk.f32.mxu1 %vm39_vm0, %v179_v35 }
  0x21   :  { %1293 = vmatmul.mubr.msk.f32.gmra.mrb[10].mxu1 %vm39_vm0, %v180_v36 }
  0x86   :  { %v148_v38 = vpop.permute.xlu0 %147 }
  0x87   :  { %v158_v39 = vpop.permute.xlu1 %157 }
  0x8a   :  { %v153_v44 = vpop.permute.xlu0 %152 }
  0x8b   :  { %v163_v53 = vpop.permute.xlu1 %162 }
  0x8e   :  { %v201_v1 = vpop.permute.xlu0 %200 }
  0x8f   :  { %v206_v0 = vpop.permute.xlu1 %205 }
  0x92   :  { %v211_v5 = vpop.permute.xlu0 %210 }
  0x93   :  { %v216_v2 = vpop.permute.xlu1 %215 }
  0x96   :  { %v1685_v17 = vpop.permute.xlu0 %220 }
  0x97   :  { %v1682_v15 = vpop.permute.xlu1 %225 }
  0x9a   :  { %v1697_v28 = vpop.permute.xlu0 %230 }
  0x9b   :  { %v1694_v25 = vpop.permute.xlu1 %235 }
  0xdf   :  { %v1265_v40 = vpop.f32.mrb[0].mxu0 }
  0xe0   :  { %v138_v41 = vmul.f32 0.0625, %v1265_v40  ;;  %v118_v42 = vpop.f32.mrb[1].mxu0  ;;  %v1279_v43 = vpop.f32.mrb[0].mxu1 }
  0xe1   :  { %v137_v45 = vmul.f32 0.0625, %v118_v42  ;;  %v360_v46 = vpop.f32.mrb[1].mxu1 }
  0xe2   :  { %v166_v47 = vadd.f32 %v153_v44, %v138_v41 }
  0xe3   :  { %v165_v48 = vadd.f32 %v148_v38, %v137_v45  ;;  %v1268_v49 = vpop.f32.mrb[2].mxu0 }
  0xe4   :  { %v140_v50 = vmul.f32 0.0625, %v1268_v49  ;;  %v128_v51 = vpop.f32.mrb[3].mxu0  ;;  %v1282_v52 = vpop.f32.mrb[2].mxu1 }
  0xe5   :  { %v139_v54 = vmul.f32 0.0625, %v128_v51  ;;  %v368_v55 = vpop.f32.mrb[3].mxu1  ;;  %v1381_v56 = vpack.c.bf16 %v166_v47, %v165_v48 }
  0xe6   :  { %v168_v57 = vadd.f32 %v163_v53, %v140_v50 }
  0xe7   :  { %v167_v58 = vadd.f32 %v158_v39, %v139_v54  ;;  %1382 = vmatprep.subr.bf16.mxu0 %v1381_v56 }
  0xe8   :  { %v1657_v59 = vpop.f32.mrb[4].mxu1  ;;  %1384 = vmatpush3.bf16.msra.mxu0 %v1381_v56 }
  0xe9   :  { %v1659_v60 = vpop.f32.mrb[5].mxu1  ;;  %v1385_v61 = vpack.c.bf16 %v168_v57, %v167_v58 }
  0xeb   :  { %1386 = vmatprep.subr.bf16.mxu0 %v1385_v61 }
  0xec   :  { %v1661_v62 = vpop.f32.mrb[6].mxu1  ;;  %1388 = vmatpush3.bf16.msra.mxu0 %v1385_v61 }
  0xed   :  { %v1663_v63 = vpop.f32.mrb[7].mxu1 }
  0xef   :  { %1304 = vmatmul.mubr.msk.f32.vlgmr.msra.gmra.mrb[4].mxu0 %vm39_vm0, %v1566_v18 }
  0xf0   :  { %1306 = vmatprep.mubr.msk.f32.mxu0 %vm39_vm0, %v1571_v19 }
  0xf3   :  { %1307 = vmatmul.mubr.msk.f32.gmra.mrb[6].mxu0 %vm39_vm0, %v1588_v22 }
  0xf4   :  { %1309 = vmatprep.mubr.msk.f32.mxu0 %vm39_vm0, %v1593_v23 }
  0xf7   :  { %1310 = vmatmul.mubr.msk.f32.gmra.mrb[8].mxu0 %vm39_vm0, %v1610_v26 }
  0xf8   :  { %1312 = vmatprep.mubr.msk.f32.mxu0 %vm39_vm0, %v1615_v27 }
  0xfb   :  { %1313 = vmatmul.mubr.msk.f32.gmra.mrb[10].mxu0 %vm39_vm0, %v176_v30 }
  0xfc   :  { %1315 = vmatprep.mubr.msk.f32.mxu0 %vm39_vm0, %v177_v33 }
  0xff   :  { %1316 = vmatmul.mubr.msk.f32.gmra.mrb[12].mxu0 %vm39_vm0, %v178_v34 }
 0x100   :  { %1318 = vmatprep.mubr.msk.f32.mxu0 %vm39_vm0, %v179_v35 }
 0x103   :  { %1319 = vmatmul.mubr.msk.f32.gmra.mrb[14].mxu0 %vm39_vm0, %v180_v36 }
 0x1c2   :  { %v1305_v4 = vpop.f32.mrb[4].mxu0 }
 0x1c3   :  { %v487_v6 = vadd.f32 %v1305_v4, %v206_v0  ;;  %v481_v7 = vpop.f32.mrb[5].mxu0 }
 0x1c4   :  { %v482_v8 = vadd.f32 %v481_v7, %v201_v1  ;;  %v1720_v7 = vpop.f32.mrb[8].mxu1 }
 0x1c5   :  { %v541_v12 = vmul.f32 0.35355338, %v487_v6 }
 0x1c6   :  { %v540_v10 = vmul.f32 0.35355338, %v482_v8  ;;  %v1308_v11 = vpop.f32.mrb[6].mxu0 }
 0x1c7   :  { %v497_v13 = vadd.f32 %v1308_v11, %v216_v2  ;;  %v491_v14 = vpop.f32.mrb[7].mxu0  ;;  %v192_v11 = vld [vmem:[%s1851_s5 + $0x58] sm:$0xff] }
 0x1c8   :  { %v492_v16 = vadd.f32 %v491_v14, %v211_v5  ;;  %1323 = vmatprep.mubr.msk.f32.mxu1 %vm544_vm2, %v540_v10 }
 0x1c9   :  { %1324 = vmatmul.mubr.msk.f32.vlgmr.msra.gmra.mrb[12].mxu1 %vm544_vm2, %v541_v12  ;;  %v543_v20 = vmul.f32 0.35355338, %v497_v13 }
 0x1ca   :  { %v542_v18 = vmul.f32 0.35355338, %v492_v16  ;;  %v1311_v19 = vpop.f32.mrb[8].mxu0  ;;  %1398 = vmatpush3.bf16.msra.mxu1 %v1523_v3 }
 0x1cb   :  { %v507_v21 = vadd.f32 %v1311_v19, %v1682_v15  ;;  %v501_v22 = vpop.f32.mrb[9].mxu0  ;;  %1400 = vmatprep.subr.bf16.mxu1 %v1535_v9 }
 0x1cc   :  { %v502_v23 = vadd.f32 %v501_v22, %v1685_v17  ;;  %1326 = vmatprep.mubr.msk.f32.mxu1 %vm544_vm2, %v542_v18 }
 0x1cd   :  { %v679_v24 = vmul.f32 %v541_v12, %v507_v21  ;;  %1327 = vmatmul.mubr.msk.f32.gmra.mrb[14].mxu1 %vm544_vm2, %v543_v20  ;;  %v1728_v12 = vpop.f32.mrb[9].mxu1 }
 0x1ce   :  { %v678_v26 = vmul.f32 %v540_v10, %v502_v23  ;;  %v1314_v27 = vpop.f32.mrb[10].mxu0  ;;  %1402 = vmatpush3.bf16.msra.mxu1 %v1535_v9  ;;  %v190_v10 = vld [vmem:[%s1851_s5 + $0x48] sm:$0xff]  ;;  %v1732_v14 = vpop.f32.mrb[10].mxu1 }
 0x1cf   :  { %v689_v29 = vsel %vm544_vm2, %v679_v24, 0.0  ;;  %v517_v30 = vadd.f32 %v1314_v27, %v1694_v25  ;;  %v511_v31 = vpop.f32.mrb[11].mxu0  ;;  %v382_v24 = vadd.f32 %v1657_v59, %v1682_v15 }
 0x1d0   :  { %v690_v32 = vrot.slane %v689_v29, 4  ;;  %v682_v33 = vsel %vm544_vm2, %v678_v26, 0.0  ;;  %v512_v34 = vadd.f32 %v511_v31, %v1697_v28  ;;  %v377_v26 = vadd.f32 %v1659_v60, %v1685_v17 }
 0x1d1   :  { %v683_v35 = vrot.slane %v682_v33, 4  ;;  %v681_v36 = vmul.f32 %v543_v20, %v517_v30 }
 0x1d2   :  { %v691_v37 = vadd.f32 %v690_v32, %v689_v29  ;;  %v680_v38 = vmul.f32 %v542_v18, %v512_v34  ;;  %v1317_v8 = vpop.f32.mrb[12].mxu0  ;;  %v1734_v18 = vpop.f32.mrb[11].mxu1  ;;  %v392_v32 = vadd.f32 %v1661_v62, %v1694_v25  ;;  %v387_v34 = vadd.f32 %v1663_v63, %v1697_v28 }
 0x1d3   :  { %v684_v39 = vadd.f32 %v683_v35, %v682_v33  ;;  %v703_v40 = vsel %vm544_vm2, %v681_v36, 0.0  ;;  %v1730_v13 = vpop.f32.mrb[13].mxu0 }
 0x1d4   :  { %v692_v41 = vrot.slane %v691_v37, 2  ;;  %v704_v42 = vrot.slane %v703_v40, 4  ;;  %v696_v43 = vsel %vm544_vm2, %v680_v38, 0.0 }
 0x1d5   :  { %v685_v44 = vrot.slane %v684_v39, 2  ;;  %v697_v45 = vrot.slane %v696_v43, 4 }
 0x1d6   :  { %v693_v46 = vadd.f32 %v692_v41, %v691_v37  ;;  %v705_v47 = vadd.f32 %v704_v42, %v703_v40  ;;  %v1320_v16 = vpop.f32.mrb[14].mxu0 }
 0x1d7   :  { %v686_v48 = vadd.f32 %v685_v44, %v684_v39  ;;  %v698_v49 = vadd.f32 %v697_v45, %v696_v43 }
 0x1d8   :  { %v694_v50 = vrot.slane %v693_v46, 1  ;;  %v706_v51 = vrot.slane %v705_v47, 2 }
 0x1d9   :  { %v687_v52 = vrot.slane %v686_v48, 1  ;;  %v699_v53 = vrot.slane %v698_v49, 2 }
 0x1da   :  { %v707_v54 = vadd.f32 %v706_v51, %v705_v47  ;;  %v1705_v56 = vadd.f32 %v694_v50, %v693_v46 }
 0x1db   :  { %v700_v55 = vadd.f32 %v699_v53, %v698_v49  ;;  %v1707_v57 = vadd.f32 %v687_v52, %v686_v48 }
 0x1dc   :  { %v708_v58 = vrot.slane %v707_v54, 1 }
 0x1dd   :  { %v701_v61 = vrot.slane %v700_v55, 1  ;;  %v729_v2 = vsel %vm714_vm3, %v1705_v56, %v1707_v57 }
 0x1de   :  { %v1711_v1 = vadd.f32 %v708_v58, %v707_v54 }
 0x1df   :  { %v1709_v0 = vadd.f32 %v701_v61, %v700_v55 }
 0x1e1   :  { %v730_v4 = vsel %vm716_vm4, %v1709_v0, %v729_v2 }
 0x1e2   :  { %v731_v5 = vsel %vm718_vm5, %v1711_v1, %v730_v4 }
 0x1e3   :  { %v734_v6 = vsel %vm733_vm6, %v731_v5, -inf }
 0x1e4   :  { %735 = vmax.xlane.f32.xlu1 %v734_v6 }
 0x1f5   :  { %245 = vperm.xlu1 %1415, %v190_v10   ;;  %v191_v10 = vld [vmem:[%s1851_s5 + $0x50] sm:$0xff] }
 0x1f9   :  { %255 = vperm.xlu1 %1415, %v192_v11   ;;  %v1465_v11 = vmov 0.0|0.0  }
 0x1fa   :  { %1389 = vmatprep.subr.bf16.mxu0 %v1465_v11 }
 0x1fb   :  { %1391 = vmatpush3.bf16.msra.mxu0 %v1523_v3 }
 0x1fc   :  { %1392 = vmatprep.subr.bf16.mxu0 %v1465_v11 }
 0x1ff   :  { %1394 = vmatpush3.bf16.msra.mxu0 %v1535_v9 }
 0x200   :  { %1403 = vmatprep.subr.bf16.mxu0 %v1465_v11 }
 0x271   :  { %v1736_v19 = vpop.xlane.xlu1 %735 }
 0x275   :  { %v1738_v20 = vpop.permute.xlu1 %245 }
 0x276   :  { %v1741_v21 = vadd.f32 %v1317_v8, %v1738_v20  ;;  %v189_v8 = vld [vmem:[%s1851_s5 + $0x40] sm:$0xff] }
 0x279   :  { %v1743_v22 = vpop.permute.xlu1 %255 }
 0x27a   :  { %v1746_v23 = vadd.f32 %v1320_v16, %v1743_v22  ;;  %v1771_v16 = vpop.f32.mrb[15].mxu0 }
 0x29c   :  { %v1325_v27 = vpop.f32.mrb[12].mxu1 }
 0x29d   :  { %v647_v29 = vmul.f32 %v1325_v27, %v382_v24  ;;  %v627_v30 = vpop.f32.mrb[13].mxu1  ;;  %v1467_v24 = vmov 0.0  }
 0x29e   :  { %v646_v31 = vmul.f32 %v627_v30, %v377_v26  ;;  %1337 = vmatprep.mubr.msk.f32.mxu0 %vm1466_vm8, %v1467_v24 }
 0x29f   :  { %v657_v33 = vsel %vm39_vm0, %v647_v29, 0.0 }
 0x2a0   :  { %v658_v35 = vrot.slane %v657_v33, 4  ;;  %v650_v36 = vsel %vm39_vm0, %v646_v31, 0.0  ;;  %v1328_v37 = vpop.f32.mrb[14].mxu1 }
 0x2a1   :  { %v651_v59 = vrot.slane %v650_v36, 4  ;;  %v649_v15 = vmul.f32 %v1328_v37, %v392_v32  ;;  %v637_v38 = vpop.f32.mrb[15].mxu1 }
 0x2a2   :  { %v659_v60 = vadd.f32 %v658_v35, %v657_v33  ;;  %v648_v17 = vmul.f32 %v637_v38, %v387_v34  ;;  %v868_v33 = vlaneseq }
 0x2a3   :  { %v652_v39 = vadd.f32 %v651_v59, %v650_v36  ;;  %v671_v40 = vsel %vm39_vm0, %v649_v15, 0.0 }
 0x2a4   :  { %v660_v41 = vrot.slane %v659_v60, 2  ;;  %v672_v42 = vrot.slane %v671_v40, 4  ;;  %v664_v62 = vsel %vm39_vm0, %v648_v17, 0.0 }
 0x2a5   :  { %v653_v25 = vrot.slane %v652_v39, 2  ;;  %v665_v43 = vrot.slane %v664_v62, 4 }
 0x2a6   :  { %v661_v44 = vadd.f32 %v660_v41, %v659_v60  ;;  %v673_v63 = vadd.f32 %v672_v42, %v671_v40 }
 0x2a7   :  { %v654_v28 = vadd.f32 %v653_v25, %v652_v39  ;;  %v666_v45 = vadd.f32 %v665_v43, %v664_v62  ;;  %v869_v62 = vshrl.u32 %v868_v33, 7 }
 0x2a8   :  { %v662_v46 = vrot.slane %v661_v44, 1  ;;  %v674_v47 = vrot.slane %v673_v63, 2 }
 0x2a9   :  { %v655_v48 = vrot.slane %v654_v28, 1  ;;  %v667_v49 = vrot.slane %v666_v45, 2 }
 0x2aa   :  { %v675_v50 = vadd.f32 %v674_v47, %v673_v63  ;;  %v663_v52 = vadd.f32 %v662_v46, %v661_v44 }
 0x2ab   :  { %v668_v51 = vadd.f32 %v667_v49, %v666_v45  ;;  %v656_v53 = vadd.f32 %v655_v48, %v654_v28  ;;  %v402_v45 = vadd.f32 %v1720_v7, %v1738_v20 }
 0x2ac   :  { %v676_v54 = vrot.slane %v675_v50, 1 }
 0x2ad   :  { %v669_v55 = vrot.slane %v668_v51, 1  ;;  %v715_v2 = vsel %vm714_vm3, %v663_v52, %v656_v53 }
 0x2ae   :  { %v677_v61 = vadd.f32 %v676_v54, %v675_v50 }
 0x2af   :  { %v670_v58 = vadd.f32 %v669_v55, %v668_v51 }
 0x2b1   :  { %v717_v4 = vsel %vm716_vm4, %v670_v58, %v715_v2 }
 0x2b2   :  { %v719_v5 = vsel %vm718_vm5, %v677_v61, %v717_v4 }
 0x2b3   :  { %v722_v6 = vsel %vm721_vm7, %v719_v5, -inf }
 0x2b4   :  { %723 = vmax.xlane.f32.xlu0 %v722_v6  ;;  %v412_v6 = vadd.f32 %v1732_v14, %v1743_v22  ;;  %v193_v22 = vld [vmem:[%s1852_s6] sm:$0xff] }
 0x2ca   :  { %240 = vperm.xlu0 %1414, %v189_v8  }
 0x2ce   :  { %250 = vperm.xlu0 %1414, %v191_v10  }
 0x341   :  { %v724_v26 = vpop.xlane.xlu0 %723 }
 0x342   :  { %v737_v27 = vmax.f32 %v724_v26, %v1736_v19 }
 0x344   :  { %v739_v29 = vrot.slane %v737_v27, 1  ;;  %v740_v30 = vrot.slane %v737_v27, 2  ;;  %v741_v31 = vrot.slane %v737_v27, 3  ;;  %v746_v3 = vsub.f32 %v656_v53, %v737_v27 }
 0x345   :  { %v758_v32 = vsub.f32 %v1707_v57, %v737_v27 }
 0x346   :  { %v747_v34 = vsub.f32 %v663_v52, %v739_v29  ;;  %v748_v35 = vsub.f32 %v670_v58, %v740_v30  ;;  %v749_v9 = vsub.f32 %v677_v61, %v741_v31  ;;  %v750_v36 = vmul.f32 1.442695, %v746_v3 }
 0x347   :  { %v759_v37 = vsub.f32 %v1705_v56, %v739_v29  ;;  %v760_v59 = vsub.f32 %v1709_v0, %v740_v30  ;;  %v761_v15 = vsub.f32 %v1711_v1, %v741_v31  ;;  %v762_v38 = vmul.f32 1.442695, %v758_v32  ;;  %v194_v30 = vld [vmem:[%s1852_s6 + $0x8] sm:$0xff]  ;;  %v195_v31 = vld [vmem:[%s1852_s6 + $0x10] sm:$0xff] }
 0x348   :  { %1416 = vpow2.f32 %v750_v36  ;;  %v752_v19 = vmul.f32 1.442695, %v747_v34  ;;  %v754_v60 = vmul.f32 1.442695, %v748_v35  ;;  %v756_v17 = vmul.f32 1.442695, %v749_v9 }
 0x349   :  { %1418 = vpow2.f32 %v762_v38  ;;  %v766_v39 = vmul.f32 1.442695, %v760_v59  ;;  %v241_v40 = vpop.permute.xlu0 %240  ;;  %v768_v57 = vmul.f32 1.442695, %v761_v15  ;;  %v764_v42 = vmul.f32 1.442695, %v759_v37 }
 0x34a   :  { %1420 = vpow2.f32 %v752_v19  ;;  %v522_v41 = vadd.f32 %v1730_v13, %v241_v40  ;;  %v1784_v56 = vsub.s32 0, %v869_v62  ;;  %v397_v43 = vadd.f32 %v1728_v12, %v241_v40 }
 0x34b   :  { %1422 = vpow2.f32 %v754_v60 }
 0x34c   :  { %1424 = vpow2.f32 %v756_v17 }
 0x34d   :  { %1426 = vpow2.f32 %v766_v39  ;;  %v251_v44 = vpop.permute.xlu0 %250 }
 0x34e   :  { %1428 = vpow2.f32 %v768_v57  ;;  %v407_v51 = vadd.f32 %v1734_v18, %v251_v44  ;;  %v532_v61 = vadd.f32 %v1771_v16, %v251_v44 }
 0x34f   :  { %1430 = vpow2.f32 %v764_v42 }
 0x352   :  { %v1417_v0 = vpop.eup %1416 }
 0x353   :  { %v1419_v1 = vpop.eup %1418  ;;  %v871_v25 = vrot.slane %v1417_v0, %v1784_v56 }
 0x354   :  { %v1421_v63 = vpop.eup %1420  ;;  %v891_v28 = vrot.slane %v1419_v1, %v1784_v56 }
 0x355   :  { %v1423_v13 = vpop.eup %1422  ;;  %v884_v46 = vmul.f32 %v871_v25, %v397_v43  ;;  %v875_v47 = vrot.slane %v1421_v63, %v1784_v56  ;;  %v774_v48 = vrot.slane %v1421_v63, 7 }
 0x356   :  { %v1425_v49 = vpop.eup %1424  ;;  %v879_v50 = vrot.slane %v1423_v13, %v1784_v56  ;;  %v776_v52 = vrot.slane %v1423_v13, 6  ;;  %v904_v53 = vmul.f32 %v891_v28, %v522_v41 }
 0x357   :  { %v1427_v12 = vpop.eup %1426  ;;  %1348 = vmatprep.mubr.msk.f32.mxu1 %vm39_vm0, %v884_v46  ;;  %v885_v54 = vmul.f32 %v875_v47, %v402_v45  ;;  %v775_v55 = vsel %vm714_vm3, %v774_v48, %v1417_v0  ;;  %v778_v58 = vrot.slane %v1425_v49, 5  ;;  %v883_v7 = vrot.slane %v1425_v49, %v1784_v56  ;;  %v1190_v46 = vld [vmem:[%s1853_s7] ss:$0 sm:$0xff] }
 0x358   :  { %v1429_v20 = vpop.eup %1428  ;;  %v886_v2 = vmul.f32 %v879_v50, %v407_v51  ;;  %v777_v4 = vsel %vm716_vm4, %v776_v52, %v775_v55  ;;  %v899_v5 = vrot.slane %v1427_v12, %v1784_v56 }
 0x359   :  { %v1431_v18 = vpop.eup %1430  ;;  %1349 = vmatmul.mubr.msk.f32.vlgmr.msra.gmra.mrb[16].mxu1 %vm39_vm0, %v885_v54  ;;  %v779_v8 = vsel %vm718_vm5, %v778_v58, %v777_v4  ;;  %v903_v10 = vrot.slane %v1429_v20, %v1784_v56  ;;  %v887_v27 = vmul.f32 %v883_v7, %v412_v6 }
 0x35a   :  { %1338 = vmatmul.mubr.msk.f32.vlgmr.msra.gmra.mrb[16].mxu0 %vm39_vm0, %v779_v8  ;;  %1351 = vmatprep.mubr.msk.f32.mxu1 %vm39_vm0, %v886_v2  ;;  %v895_v16 = vrot.slane %v1431_v18, %v1784_v56  ;;  %v906_v26 = vmul.f32 %v899_v5, %v532_v61 }
 0x35b   :  { %v907_v29 = vmul.f32 %v903_v10, %v1746_v23  ;;  %1362 = vmatprep.mubr.msk.f32.mxu0 %vm1466_vm8, %v1467_v24  ;;  %v1404_v23 = vpack.c.bf16 %v194_v30, %v193_v22  ;;  %v196_v24 = vld [vmem:[%s1852_s6 + $0x18] sm:$0xff] }
 0x35c   :  { %v905_v14 = vmul.f32 %v895_v16, %v1741_v21  ;;  %v1407_v21 = vpack.c.bf16 %v196_v24, %v195_v31 }
 0x35d   :  { %1352 = vmatmul.mubr.msk.f32.gmra.mrb[18].mxu1 %vm39_vm0, %v887_v27  ;;  %1405 = vmatpush3.bf16.msra.mxu0 %v1404_v23 }
 0x35e   :  { %1406 = vmatprep.subr.bf16.mxu0 %v1465_v11 }
 0x361   :  { %1408 = vmatpush3.bf16.msra.mxu0 %v1407_v21 }
 0x42c   :  { %v1350_v3 = vpop.f32.mrb[16].mxu1 }
 0x42d   :  { %v992_v32 = vadd.f32 %v1350_v3, %v905_v14  ;;  %v848_v33 = vpop.f32.mrb[16].mxu0  ;;  %v986_v34 = vpop.f32.mrb[17].mxu1 }
 0x42e   :  { %v853_v35 = vrot.slane %v848_v33, 1  ;;  %v854_v9 = vrot.slane %v848_v33, 2  ;;  %v855_v36 = vrot.slane %v848_v33, 3  ;;  %v860_v37 = vadd.f32 %v1419_v1, %v848_v33  ;;  %v1339_v59 = vpop.f32.mrb[17].mxu0 }
 0x42f   :  { %v987_v15 = vadd.f32 %v986_v34, %v904_v53 }
 0x430   :  { %v861_v38 = vadd.f32 %v1431_v18, %v853_v35  ;;  %v862_v19 = vadd.f32 %v1427_v12, %v854_v9  ;;  %v863_v60 = vadd.f32 %v1429_v20, %v855_v36  ;;  %1432 = vrcp.f32 %v860_v37  ;;  %v1353_v17 = vpop.f32.mrb[18].mxu1 }
 0x431   :  { %v1002_v39 = vadd.f32 %v1353_v17, %v907_v29  ;;  %v996_v40 = vpop.f32.mrb[19].mxu1 }
 0x432   :  { %1434 = vrcp.f32 %v861_v38  ;;  %v997_v11 = vadd.f32 %v996_v40, %v906_v26 }
 0x433   :  { %1436 = vrcp.f32 %v862_v19 }
 0x434   :  { %1438 = vrcp.f32 %v863_v60 }
 0x43a   :  { %v1433_v57 = vpop.eup %1432 }
 0x43b   :  { %v1008_v41 = vrot.slane %v1433_v57, %v1784_v56 }
 0x43c   :  { %v1435_v42 = vpop.eup %1434 }
 0x43d   :  { %v1437_v62 = vpop.eup %1436  ;;  %v1021_v0 = vmul.f32 %v1008_v41, %v987_v15  ;;  %v1012_v1 = vrot.slane %v1435_v42, %v1784_v56 }
 0x43e   :  { %v1439_v25 = vpop.eup %1438  ;;  %v1016_v43 = vrot.slane %v1437_v62, %v1784_v56 }
 0x43f   :  { %v1020_v44 = vrot.slane %v1439_v25, %v1784_v56  ;;  %1025 = vxpose.xlu0.b32.start [1/4] (short) (narrow) %v1021_v0, 8  ;;  %v1022_v63 = vmul.f32 %v1012_v1, %v992_v32 }
 0x440   :  { %v1023_v28 = vmul.f32 %v1016_v43, %v997_v11 }
 0x441   :  { %v1024_v13 = vmul.f32 %v1020_v44, %v1002_v39 }
 0x443   :  { %1026 = vxpose.xlu0.b32.cont [2/4] (short) (narrow) %v1022_v63, 8 }
 0x447   :  { %1027 = vxpose.xlu0.b32.cont [3/4] (short) (narrow) %v1023_v28, 8 }
 0x44b   :  { %1028 = vxpose.xlu0.b32.end [4/4] (short) (narrow) %v1024_v13, 8 }
 0x4bf   :  { %v1041_v45 = vpop.trf.xlu0 }
 0x4c0   :  { %1363 = vmatmul.mubr.msk.f32.vlgmr.msra.gmra.mrb[18].mxu0 %vm39_vm0, %v1041_v45 }
 0x593   :  { %v1132_v47 = vpop.f32.mrb[18].mxu0 }
 0x594   :  { %v1133_v48 = vadd.f32 %v1190_v46, %v1132_v47  ;;  %v1364_v56 = vpop.f32.mrb[19].mxu0 }
 0x596   :  { %1137 = vst.msk [vmem:[#allocation2] sm:$0x3] %vm1136_vm9, %v1133_v48 }
 0x597   :  { %1451 = shalt.err (!%p1448_p4)
}
 0x598   :  { %s1452_s15 = scalar_lea.hbm %s1854_s8, 32 }
 0x599   :  { %p1453_p5 = scmp.ne.s32.totalorder %s1854_s8, %s1452_s15  ;;  %p1456_p6 = scmp.lt.u32.totalorder %s1452_s15, %s1854_s8 }
 0x59b   :  { %p1458_p7 = pnand %p1456_p6, %p1453_p5 }
 0x59d   :  { %1461 = shalt.err (!%p1458_p7)
}
 0x59e   :  { %1147 = dma.vmem_to_hbm [thread:$0]  %s1145_s12, 32, %s1854_s8, [#allocation3]  }
 0x59f   :  { %1462 = dma.done.wait [#allocation3], 32  }
 0x5a0   :  { %1463 = vsyncadd [#allocation3], 4294967264 }
 0x5a1   :  { %1151 = vsyncpa [#allocation3], 1 }

// kernel: tpu_custom_call.1
= control target key start
LH: loop header
LB: loop body
LE: loop exit
PB: predicated region body
PF: predicated region fallthrough
CT: control target
= control target key end

     0   :  { %vm39_vm0 = vcmask 261120   ;;  %v1464_v7 = vmov 0   ;;  %s1846_s0 = inlined_call_operand.vmem [shape: f32[1,32,32], index: 0, kind: input, shape index: {}]   ;;  %s1847_s1 = inlined_call_operand.vmem [shape: f32[32,1], index: 1, kind: input, shape index: {}]   ;;  %s1848_s2 = inlined_call_operand.vmem [shape: f32[32,2], index: 2, kind: input, shape index: {}]   ;;  %s1849_s3 = inlined_call_operand.vmem [shape: f32[2,32], index: 3, kind: input, shape index: {}]   ;;  %s1850_s4 = inlined_call_operand.vmem [shape: f32[96,32], index: 4, kind: input, shape index: {}]   ;;  %s1851_s5 = inlined_call_operand.vmem [shape: f32[96,1], index: 5, kind: input, shape index: {}]   ;;  %s1852_s6 = inlined_call_operand.vmem [shape: f32[32,16], index: 6, kind: input, shape index: {}]   ;;  %s1853_s7 = inlined_call_operand.vmem [shape: f32[1,16], index: 7, kind: input, shape index: {}]   ;;  %s1854_s8 = inlined_call_operand.hbm [shape: f32[1,2,16], index: 8, kind: output, shape index: {}]  }
   0x1   :  { %v34_v0 = vld [vmem:[%s1848_s2] sm:$0xff]  ;;  %v35_v1 = vld [vmem:[%s1848_s2 + $0x8] sm:$0xff]  ;;  %v36_v5 = vld [vmem:[%s1848_s2 + $0x10] sm:$0xff]  ;;  %1414 = vset.pattern.permute.xlu0 %v1464_v7  ;;  %1415 = vset.pattern.permute.xlu1 %v1464_v7 }
   0x2   :  { %v30_v2 = vld [vmem:[%s1846_s0] sm:$0xff]  ;;  %v1523_v3 = vpack.c.bf16 %v35_v1, %v34_v0  ;;  %v31_v4 = vld [vmem:[%s1846_s0 + $0x8] sm:$0xff]  ;;  %v37_v6 = vld [vmem:[%s1848_s2 + $0x18] sm:$0xff] }
   0x3   :  { %1263 = vmatprep.mubr.msk.f32.mxu0 %vm39_vm0, %v30_v2  ;;  %v1373_v8 = vpack.c.bf16 %v31_v4, %v30_v2  ;;  %v1535_v9 = vpack.c.bf16 %v37_v6, %v36_v5  ;;  %v32_v10 = vld [vmem:[%s1846_s0 + $0x10] sm:$0xff]  ;;  %v33_v11 = vld [vmem:[%s1846_s0 + $0x18] sm:$0xff]  ;;  %v169_v12 = vld [vmem:[%s1850_s4] sm:$0xff] }
   0x4   :  { %1366 = vmatprep.subr.bf16.mxu0 %v1523_v3  ;;  %v1377_v13 = vpack.c.bf16 %v33_v11, %v32_v10  ;;  %1277 = vmatprep.mubr.msk.f32.mxu1 %vm39_vm0, %v169_v12  ;;  %v141_v14 = vld [vmem:[%s1847_s1] sm:$0xff]  ;;  %v143_v15 = vld [vmem:[%s1847_s1 + $0x10] sm:$0xff]  ;;  %v142_v16 = vld [vmem:[%s1847_s1 + $0x8] sm:$0xff] }
   0x5   :  { %1374 = vmatprep.subr.bf16.mxu1 %v1373_v8  ;;  %1368 = vmatpush3.bf16.msra.mxu0 %v1523_v3  ;;  %v144_v17 = vld [vmem:[%s1847_s1 + $0x18] sm:$0xff]  ;;  %v1566_v18 = vld [vmem:[%s1850_s4 + $0x8] sm:$0xff] }
   0x6   :  { %1376 = vmatpush3.bf16.msra.mxu1 %v1373_v8  ;;  %1370 = vmatprep.subr.bf16.mxu0 %v1535_v9 }
   0x7   :  { %1378 = vmatprep.subr.bf16.mxu1 %v1377_v13  ;;  %147 = vperm.xlu0 %1414, %v141_v14  }
   0x8   :  { %157 = vperm.xlu1 %1415, %v143_v15  }
   0x9   :  { %1372 = vmatpush3.bf16.msra.mxu0 %v1535_v9 }
   0xa   :  { %1380 = vmatpush3.bf16.msra.mxu1 %v1377_v13 }
   0xb   :  { %13 = vsyncpa [#allocation3], 0  ;;  %v1571_v19 = vld [vmem:[%s1850_s4 + $0x10] sm:$0xff]  ;;  %152 = vperm.xlu0 %1414, %v142_v16   ;;  %v181_v20 = vld [vmem:[%s1851_s5] sm:$0xff]  ;;  %vm557_vm1 = vcmask 1041408   ;;  %vm544_vm2 = vcmask 15360  }
   0xc   :  { %1264 = vmatmul.mubr.msk.f32.vlgmr.msra.gmra.mrb[0].mxu0 %vm39_vm0, %v31_v4  ;;  %162 = vperm.xlu1 %1415, %v144_v17   ;;  %v182_v21 = vld [vmem:[%s1851_s5 + $0x8] sm:$0xff]  ;;  %v1588_v22 = vld [vmem:[%s1850_s4 + $0x18] sm:$0xff]  ;;  %v1593_v23 = vld [vmem:[%s1850_s4 + $0x20] sm:$0xff]  ;;  %vm714_vm3 = vcmask 1041409   ;;  %vm716_vm4 = vcmask 1042434   ;;  %vm718_vm5 = vcmask 1043459  }
   0xd   :  { %1278 = vmatmul.mubr.msk.f32.vlgmr.msra.gmra.mrb[0].mxu1 %vm39_vm0, %v1566_v18  ;;  %1266 = vmatprep.mubr.msk.f32.mxu0 %vm39_vm0, %v32_v10  ;;  %v183_v24 = vld [vmem:[%s1851_s5 + $0x10] sm:$0xff]  ;;  %v184_v25 = vld [vmem:[%s1851_s5 + $0x18] sm:$0xff]  ;;  %v1610_v26 = vld [vmem:[%s1850_s4 + $0x28] sm:$0xff]  ;;  %vm733_vm6 = vcmask 11264   ;;  %vm721_vm7 = vcmask 257024   ;;  %vm1466_vm8 = vmmov 0  }
   0xe   :  { %1280 = vmatprep.mubr.msk.f32.mxu1 %vm39_vm0, %v1571_v19  ;;  %v1615_v27 = vld [vmem:[%s1850_s4 + $0x30] sm:$0xff]  ;;  %v185_v28 = vld [vmem:[%s1851_s5 + $0x20] sm:$0xff]  ;;  %v186_v29 = vld [vmem:[%s1851_s5 + $0x28] sm:$0xff]  ;;  %s1468_s11 = smov [#allocation2]   ;;  %vm1136_vm9 = vcmask 123904  }
   0xf   :  { %200 = vperm.xlu0 %1414, %v181_v20   ;;  %v176_v30 = vld [vmem:[%s1850_s4 + $0x38] sm:$0xff]  ;;  %v187_v31 = vld [vmem:[%s1851_s5 + $0x30] sm:$0xff]  ;;  %v177_v33 = vld [vmem:[%s1850_s4 + $0x40] sm:$0xff]  ;;  %s1144_s12 = sshll.u32 %s1468_s11, 4  ;;  %s1145_s12 = int_to_ptr.vmem [resolvable:$true] %s1144_s12 }
  0x10   :  { %1267 = vmatmul.mubr.msk.f32.gmra.mrb[2].mxu0 %vm39_vm0, %v33_v11  ;;  %205 = vperm.xlu1 %1415, %v182_v21   ;;  %v188_v32 = vld [vmem:[%s1851_s5 + $0x38] sm:$0xff]  ;;  %v178_v34 = vld [vmem:[%s1850_s4 + $0x48] sm:$0xff]  ;;  %v179_v35 = vld [vmem:[%s1850_s4 + $0x50] sm:$0xff]  ;;  %s1440_s1 = scalar_lea.vmem %s1145_s12, 32  ;;  %p1445_p1 = scmp.lt.s32.totalorder %s1145_s12, %s1145_s12 }
  0x11   :  { %1281 = vmatmul.mubr.msk.f32.gmra.mrb[2].mxu1 %vm39_vm0, %v1588_v22  ;;  %1303 = vmatprep.mubr.msk.f32.mxu0 %vm39_vm0, %v169_v12  ;;  %v180_v36 = vld [vmem:[%s1850_s4 + $0x58] sm:$0xff]  ;;  %v38_v37 = vld [vmem:[%s1849_s3] sm:$0x3]  ;;  %p1441_p0 = scmp.ne.s32.totalorder %s1145_s12, %s1440_s1  ;;  %p1446_p2 = scmp.lt.s32.totalorder %s1440_s1, %s1440_s1 }
  0x12   :  { %1283 = vmatprep.mubr.msk.f32.mxu1 %vm39_vm0, %v1593_v23  ;;  %1321 = vmatprep.subr.msk.mxu1 %vm557_vm1, %v38_v37 }
  0x13   :  { %210 = vperm.xlu0 %1414, %v183_v24   ;;  %1322 = vmatpush3.msk.msra.mxu1 %vm557_vm1, %v38_v37  ;;  %p1447_p3 = por %p1446_p2, %p1445_p1 }
  0x14   :  { %215 = vperm.xlu1 %1415, %v184_v25   ;;  %1396 = vmatprep.subr.bf16.mxu1 %v1523_v3 }
  0x15   :  { %1284 = vmatmul.mubr.msk.f32.gmra.mrb[4].mxu1 %vm39_vm0, %v1610_v26  ;;  %p1448_p4 = pnand %p1447_p3, %p1441_p0 }
  0x16   :  { %1286 = vmatprep.mubr.msk.f32.mxu1 %vm39_vm0, %v1615_v27 }
  0x17   :  { %220 = vperm.xlu0 %1414, %v185_v28  }
  0x18   :  { %225 = vperm.xlu1 %1415, %v186_v29  }
  0x19   :  { %1287 = vmatmul.mubr.msk.f32.gmra.mrb[6].mxu1 %vm39_vm0, %v176_v30 }
  0x1a   :  { %1289 = vmatprep.mubr.msk.f32.mxu1 %vm39_vm0, %v177_v33 }
  0x1b   :  { %230 = vperm.xlu0 %1414, %v187_v31  }
  0x1c   :  { %235 = vperm.xlu1 %1415, %v188_v32  }
  0x1d   :  { %1290 = vmatmul.mubr.msk.f32.gmra.mrb[8].mxu1 %vm39_vm0, %v178_v34 }
  0x1e   :  { %1292 = vmatprep.mubr.msk.f32.mxu1 %vm39_vm0, %v179_v35 }
  0x21   :  { %1293 = vmatmul.mubr.msk.f32.gmra.mrb[10].mxu1 %vm39_vm0, %v180_v36 }
  0x86   :  { %v148_v38 = vpop.permute.xlu0 %147 }
  0x87   :  { %v158_v39 = vpop.permute.xlu1 %157 }
  0x8a   :  { %v153_v44 = vpop.permute.xlu0 %152 }
  0x8b   :  { %v163_v53 = vpop.permute.xlu1 %162 }
  0x8e   :  { %v201_v1 = vpop.permute.xlu0 %200 }
  0x8f   :  { %v206_v0 = vpop.permute.xlu1 %205 }
  0x92   :  { %v211_v5 = vpop.permute.xlu0 %210 }
  0x93   :  { %v216_v2 = vpop.permute.xlu1 %215 }
  0x96   :  { %v1685_v17 = vpop.permute.xlu0 %220 }
  0x97   :  { %v1682_v15 = vpop.permute.xlu1 %225 }
  0x9a   :  { %v1697_v28 = vpop.permute.xlu0 %230 }
  0x9b   :  { %v1694_v25 = vpop.permute.xlu1 %235 }
  0xdf   :  { %v1265_v40 = vpop.f32.mrb[0].mxu0 }
  0xe0   :  { %v138_v41 = vmul.f32 0.0625, %v1265_v40  ;;  %v118_v42 = vpop.f32.mrb[1].mxu0  ;;  %v1279_v43 = vpop.f32.mrb[0].mxu1 }
  0xe1   :  { %v137_v45 = vmul.f32 0.0625, %v118_v42  ;;  %v360_v46 = vpop.f32.mrb[1].mxu1 }
  0xe2   :  { %v166_v47 = vadd.f32 %v153_v44, %v138_v41 }
  0xe3   :  { %v165_v48 = vadd.f32 %v148_v38, %v137_v45  ;;  %v1268_v49 = vpop.f32.mrb[2].mxu0 }
  0xe4   :  { %v140_v50 = vmul.f32 0.0625, %v1268_v49  ;;  %v128_v51 = vpop.f32.mrb[3].mxu0  ;;  %v1282_v52 = vpop.f32.mrb[2].mxu1 }
  0xe5   :  { %v139_v54 = vmul.f32 0.0625, %v128_v51  ;;  %v368_v55 = vpop.f32.mrb[3].mxu1  ;;  %v1381_v56 = vpack.c.bf16 %v166_v47, %v165_v48 }
  0xe6   :  { %v168_v57 = vadd.f32 %v163_v53, %v140_v50 }
  0xe7   :  { %v167_v58 = vadd.f32 %v158_v39, %v139_v54  ;;  %1382 = vmatprep.subr.bf16.mxu0 %v1381_v56 }
  0xe8   :  { %v1657_v59 = vpop.f32.mrb[4].mxu1  ;;  %1384 = vmatpush3.bf16.msra.mxu0 %v1381_v56 }
  0xe9   :  { %v1659_v60 = vpop.f32.mrb[5].mxu1  ;;  %v1385_v61 = vpack.c.bf16 %v168_v57, %v167_v58 }
  0xeb   :  { %1386 = vmatprep.subr.bf16.mxu0 %v1385_v61 }
  0xec   :  { %v1661_v62 = vpop.f32.mrb[6].mxu1  ;;  %1388 = vmatpush3.bf16.msra.mxu0 %v1385_v61 }
  0xed   :  { %v1663_v63 = vpop.f32.mrb[7].mxu1 }
  0xef   :  { %1304 = vmatmul.mubr.msk.f32.vlgmr.msra.gmra.mrb[4].mxu0 %vm39_vm0, %v1566_v18 }
  0xf0   :  { %1306 = vmatprep.mubr.msk.f32.mxu0 %vm39_vm0, %v1571_v19 }
  0xf3   :  { %1307 = vmatmul.mubr.msk.f32.gmra.mrb[6].mxu0 %vm39_vm0, %v1588_v22 }
  0xf4   :  { %1309 = vmatprep.mubr.msk.f32.mxu0 %vm39_vm0, %v1593_v23 }
  0xf7   :  { %1310 = vmatmul.mubr.msk.f32.gmra.mrb[8].mxu0 %vm39_vm0, %v1610_v26 }
  0xf8   :  { %1312 = vmatprep.mubr.msk.f32.mxu0 %vm39_vm0, %v1615_v27 }
  0xfb   :  { %1313 = vmatmul.mubr.msk.f32.gmra.mrb[10].mxu0 %vm39_vm0, %v176_v30 }
  0xfc   :  { %1315 = vmatprep.mubr.msk.f32.mxu0 %vm39_vm0, %v177_v33 }
  0xff   :  { %1316 = vmatmul.mubr.msk.f32.gmra.mrb[12].mxu0 %vm39_vm0, %v178_v34 }
 0x100   :  { %1318 = vmatprep.mubr.msk.f32.mxu0 %vm39_vm0, %v179_v35 }
 0x103   :  { %1319 = vmatmul.mubr.msk.f32.gmra.mrb[14].mxu0 %vm39_vm0, %v180_v36 }
 0x1c2   :  { %v1305_v4 = vpop.f32.mrb[4].mxu0 }
 0x1c3   :  { %v487_v6 = vadd.f32 %v1305_v4, %v206_v0  ;;  %v481_v7 = vpop.f32.mrb[5].mxu0 }
 0x1c4   :  { %v482_v8 = vadd.f32 %v481_v7, %v201_v1  ;;  %v1720_v7 = vpop.f32.mrb[8].mxu1 }
 0x1c5   :  { %v541_v12 = vmul.f32 0.35355338, %v487_v6 }
 0x1c6   :  { %v540_v10 = vmul.f32 0.35355338, %v482_v8  ;;  %v1308_v11 = vpop.f32.mrb[6].mxu0 }
 0x1c7   :  { %v497_v13 = vadd.f32 %v1308_v11, %v216_v2  ;;  %v491_v14 = vpop.f32.mrb[7].mxu0  ;;  %v192_v11 = vld [vmem:[%s1851_s5 + $0x58] sm:$0xff] }
 0x1c8   :  { %v492_v16 = vadd.f32 %v491_v14, %v211_v5  ;;  %1323 = vmatprep.mubr.msk.f32.mxu1 %vm544_vm2, %v540_v10 }
 0x1c9   :  { %1324 = vmatmul.mubr.msk.f32.vlgmr.msra.gmra.mrb[12].mxu1 %vm544_vm2, %v541_v12  ;;  %v543_v20 = vmul.f32 0.35355338, %v497_v13 }
 0x1ca   :  { %v542_v18 = vmul.f32 0.35355338, %v492_v16  ;;  %v1311_v19 = vpop.f32.mrb[8].mxu0  ;;  %1398 = vmatpush3.bf16.msra.mxu1 %v1523_v3 }
 0x1cb   :  { %v507_v21 = vadd.f32 %v1311_v19, %v1682_v15  ;;  %v501_v22 = vpop.f32.mrb[9].mxu0  ;;  %1400 = vmatprep.subr.bf16.mxu1 %v1535_v9 }
 0x1cc   :  { %v502_v23 = vadd.f32 %v501_v22, %v1685_v17  ;;  %1326 = vmatprep.mubr.msk.f32.mxu1 %vm544_vm2, %v542_v18 }
 0x1cd   :  { %v679_v24 = vmul.f32 %v541_v12, %v507_v21  ;;  %1327 = vmatmul.mubr.msk.f32.gmra.mrb[14].mxu1 %vm544_vm2, %v543_v20  ;;  %v1728_v12 = vpop.f32.mrb[9].mxu1 }
 0x1ce   :  { %v678_v26 = vmul.f32 %v540_v10, %v502_v23  ;;  %v1314_v27 = vpop.f32.mrb[10].mxu0  ;;  %1402 = vmatpush3.bf16.msra.mxu1 %v1535_v9  ;;  %v190_v10 = vld [vmem:[%s1851_s5 + $0x48] sm:$0xff]  ;;  %v1732_v14 = vpop.f32.mrb[10].mxu1 }
 0x1cf   :  { %v689_v29 = vsel %vm544_vm2, %v679_v24, 0.0  ;;  %v517_v30 = vadd.f32 %v1314_v27, %v1694_v25  ;;  %v511_v31 = vpop.f32.mrb[11].mxu0  ;;  %v382_v24 = vadd.f32 %v1657_v59, %v1682_v15 }
 0x1d0   :  { %v690_v32 = vrot.slane %v689_v29, 4  ;;  %v682_v33 = vsel %vm544_vm2, %v678_v26, 0.0  ;;  %v512_v34 = vadd.f32 %v511_v31, %v1697_v28  ;;  %v377_v26 = vadd.f32 %v1659_v60, %v1685_v17 }
 0x1d1   :  { %v683_v35 = vrot.slane %v682_v33, 4  ;;  %v681_v36 = vmul.f32 %v543_v20, %v517_v30 }
 0x1d2   :  { %v691_v37 = vadd.f32 %v690_v32, %v689_v29  ;;  %v680_v38 = vmul.f32 %v542_v18, %v512_v34  ;;  %v1317_v8 = vpop.f32.mrb[12].mxu0  ;;  %v1734_v18 = vpop.f32.mrb[11].mxu1  ;;  %v392_v32 = vadd.f32 %v1661_v62, %v1694_v25  ;;  %v387_v34 = vadd.f32 %v1663_v63, %v1697_v28 }
 0x1d3   :  { %v684_v39 = vadd.f32 %v683_v35, %v682_v33  ;;  %v703_v40 = vsel %vm544_vm2, %v681_v36, 0.0  ;;  %v1730_v13 = vpop.f32.mrb[13].mxu0 }
 0x1d4   :  { %v692_v41 = vrot.slane %v691_v37, 2  ;;  %v704_v42 = vrot.slane %v703_v40, 4  ;;  %v696_v43 = vsel %vm544_vm2, %v680_v38, 0.0 }
 0x1d5   :  { %v685_v44 = vrot.slane %v684_v39, 2  ;;  %v697_v45 = vrot.slane %v696_v43, 4 }
 0x1d6   :  { %v693_v46 = vadd.f32 %v692_v41, %v691_v37  ;;  %v705_v47 = vadd.f32 %v704_v42, %v703_v40  ;;  %v1320_v16 = vpop.f32.mrb[14].mxu0 }
 0x1d7   :  { %v686_v48 = vadd.f32 %v685_v44, %v684_v39  ;;  %v698_v49 = vadd.f32 %v697_v45, %v696_v43 }
 0x1d8   :  { %v694_v50 = vrot.slane %v693_v46, 1  ;;  %v706_v51 = vrot.slane %v705_v47, 2 }
 0x1d9   :  { %v687_v52 = vrot.slane %v686_v48, 1  ;;  %v699_v53 = vrot.slane %v698_v49, 2 }
 0x1da   :  { %v707_v54 = vadd.f32 %v706_v51, %v705_v47  ;;  %v1705_v56 = vadd.f32 %v694_v50, %v693_v46 }
 0x1db   :  { %v700_v55 = vadd.f32 %v699_v53, %v698_v49  ;;  %v1707_v57 = vadd.f32 %v687_v52, %v686_v48 }
 0x1dc   :  { %v708_v58 = vrot.slane %v707_v54, 1 }
 0x1dd   :  { %v701_v61 = vrot.slane %v700_v55, 1  ;;  %v729_v2 = vsel %vm714_vm3, %v1705_v56, %v1707_v57 }
 0x1de   :  { %v1711_v1 = vadd.f32 %v708_v58, %v707_v54 }
 0x1df   :  { %v1709_v0 = vadd.f32 %v701_v61, %v700_v55 }
 0x1e1   :  { %v730_v4 = vsel %vm716_vm4, %v1709_v0, %v729_v2 }
 0x1e2   :  { %v731_v5 = vsel %vm718_vm5, %v1711_v1, %v730_v4 }
 0x1e3   :  { %v734_v6 = vsel %vm733_vm6, %v731_v5, -inf }
 0x1e4   :  { %735 = vmax.xlane.f32.xlu1 %v734_v6 }
 0x1f5   :  { %245 = vperm.xlu1 %1415, %v190_v10   ;;  %v191_v10 = vld [vmem:[%s1851_s5 + $0x50] sm:$0xff] }
 0x1f9   :  { %255 = vperm.xlu1 %1415, %v192_v11   ;;  %v1465_v11 = vmov 0.0|0.0  }
 0x1fa   :  { %1389 = vmatprep.subr.bf16.mxu0 %v1465_v11 }
 0x1fb   :  { %1391 = vmatpush3.bf16.msra.mxu0 %v1523_v3 }
 0x1fc   :  { %1392 = vmatprep.subr.bf16.mxu0 %v1465_v11 }
 0x1ff   :  { %1394 = vmatpush3.bf16.msra.mxu0 %v1535_v9 }
 0x200   :  { %1403 = vmatprep.subr.bf16.mxu0 %v1465_v11 }
 0x271   :  { %v1736_v19 = vpop.xlane.xlu1 %735 }
 0x275   :  { %v1738_v20 = vpop.permute.xlu1 %245 }
 0x276   :  { %v1741_v21 = vadd.f32 %v1317_v8, %v1738_v20  ;;  %v189_v8 = vld [vmem:[%s1851_s5 + $0x40] sm:$0xff] }
 0x279   :  { %v1743_v22 = vpop.permute.xlu1 %255 }
 0x27a   :  { %v1746_v23 = vadd.f32 %v1320_v16, %v1743_v22  ;;  %v1771_v16 = vpop.f32.mrb[15].mxu0 }
 0x29c   :  { %v1325_v27 = vpop.f32.mrb[12].mxu1 }
 0x29d   :  { %v647_v29 = vmul.f32 %v1325_v27, %v382_v24  ;;  %v627_v30 = vpop.f32.mrb[13].mxu1  ;;  %v1467_v24 = vmov 0.0  }
 0x29e   :  { %v646_v31 = vmul.f32 %v627_v30, %v377_v26  ;;  %1337 = vmatprep.mubr.msk.f32.mxu0 %vm1466_vm8, %v1467_v24 }
 0x29f   :  { %v657_v33 = vsel %vm39_vm0, %v647_v29, 0.0 }
 0x2a0   :  { %v658_v35 = vrot.slane %v657_v33, 4  ;;  %v650_v36 = vsel %vm39_vm0, %v646_v31, 0.0  ;;  %v1328_v37 = vpop.f32.mrb[14].mxu1 }
 0x2a1   :  { %v651_v59 = vrot.slane %v650_v36, 4  ;;  %v649_v15 = vmul.f32 %v1328_v37, %v392_v32  ;;  %v637_v38 = vpop.f32.mrb[15].mxu1 }
 0x2a2   :  { %v659_v60 = vadd.f32 %v658_v35, %v657_v33  ;;  %v648_v17 = vmul.f32 %v637_v38, %v387_v34  ;;  %v868_v33 = vlaneseq }
 0x2a3   :  { %v652_v39 = vadd.f32 %v651_v59, %v650_v36  ;;  %v671_v40 = vsel %vm39_vm0, %v649_v15, 0.0 }
 0x2a4   :  { %v660_v41 = vrot.slane %v659_v60, 2  ;;  %v672_v42 = vrot.slane %v671_v40, 4  ;;  %v664_v62 = vsel %vm39_vm0, %v648_v17, 0.0 }
 0x2a5   :  { %v653_v25 = vrot.slane %v652_v39, 2  ;;  %v665_v43 = vrot.slane %v664_v62, 4 }
 0x2a6   :  { %v661_v44 = vadd.f32 %v660_v41, %v659_v60  ;;  %v673_v63 = vadd.f32 %v672_v42, %v671_v40 }
 0x2a7   :  { %v654_v28 = vadd.f32 %v653_v25, %v652_v39  ;;  %v666_v45 = vadd.f32 %v665_v43, %v664_v62  ;;  %v869_v62 = vshrl.u32 %v868_v33, 7 }
 0x2a8   :  { %v662_v46 = vrot.slane %v661_v44, 1  ;;  %v674_v47 = vrot.slane %v673_v63, 2 }
 0x2a9   :  { %v655_v48 = vrot.slane %v654_v28, 1  ;;  %v667_v49 = vrot.slane %v666_v45, 2 }
 0x2aa   :  { %v675_v50 = vadd.f32 %v674_v47, %v673_v63  ;;  %v663_v52 = vadd.f32 %v662_v46, %v661_v44 }
 0x2ab   :  { %v668_v51 = vadd.f32 %v667_v49, %v666_v45  ;;  %v656_v53 = vadd.f32 %v655_v48, %v654_v28  ;;  %v402_v45 = vadd.f32 %v1720_v7, %v1738_v20 }
 0x2ac   :  { %v676_v54 = vrot.slane %v675_v50, 1 }
 0x2ad   :  { %v669_v55 = vrot.slane %v668_v51, 1  ;;  %v715_v2 = vsel %vm714_vm3, %v663_v52, %v656_v53 }
 0x2ae   :  { %v677_v61 = vadd.f32 %v676_v54, %v675_v50 }
 0x2af   :  { %v670_v58 = vadd.f32 %v669_v55, %v668_v51 }
 0x2b1   :  { %v717_v4 = vsel %vm716_vm4, %v670_v58, %v715_v2 }
 0x2b2   :  { %v719_v5 = vsel %vm718_vm5, %v677_v61, %v717_v4 }
 0x2b3   :  { %v722_v6 = vsel %vm721_vm7, %v719_v5, -inf }
 0x2b4   :  { %723 = vmax.xlane.f32.xlu0 %v722_v6  ;;  %v412_v6 = vadd.f32 %v1732_v14, %v1743_v22  ;;  %v193_v22 = vld [vmem:[%s1852_s6] sm:$0xff] }
 0x2ca   :  { %240 = vperm.xlu0 %1414, %v189_v8  }
 0x2ce   :  { %250 = vperm.xlu0 %1414, %v191_v10  }
 0x341   :  { %v724_v26 = vpop.xlane.xlu0 %723 }
 0x342   :  { %v737_v27 = vmax.f32 %v724_v26, %v1736_v19 }
 0x344   :  { %v739_v29 = vrot.slane %v737_v27, 1  ;;  %v740_v30 = vrot.slane %v737_v27, 2  ;;  %v741_v31 = vrot.slane %v737_v27, 3  ;;  %v746_v3 = vsub.f32 %v656_v53, %v737_v27 }
 0x345   :  { %v758_v32 = vsub.f32 %v1707_v57, %v737_v27 }
 0x346   :  { %v747_v34 = vsub.f32 %v663_v52, %v739_v29  ;;  %v748_v35 = vsub.f32 %v670_v58, %v740_v30  ;;  %v749_v9 = vsub.f32 %v677_v61, %v741_v31  ;;  %v750_v36 = vmul.f32 1.442695, %v746_v3 }
 0x347   :  { %v759_v37 = vsub.f32 %v1705_v56, %v739_v29  ;;  %v760_v59 = vsub.f32 %v1709_v0, %v740_v30  ;;  %v761_v15 = vsub.f32 %v1711_v1, %v741_v31  ;;  %v762_v38 = vmul.f32 1.442695, %v758_v32  ;;  %v194_v30 = vld [vmem:[%s1852_s6 + $0x8] sm:$0xff]  ;;  %v195_v31 = vld [vmem:[%s1852_s6 + $0x10] sm:$0xff] }
 0x348   :  { %1416 = vpow2.f32 %v750_v36  ;;  %v752_v19 = vmul.f32 1.442695, %v747_v34  ;;  %v754_v60 = vmul.f32 1.442695, %v748_v35  ;;  %v756_v17 = vmul.f32 1.442695, %v749_v9 }
 0x349   :  { %1418 = vpow2.f32 %v762_v38  ;;  %v766_v39 = vmul.f32 1.442695, %v760_v59  ;;  %v241_v40 = vpop.permute.xlu0 %240  ;;  %v768_v57 = vmul.f32 1.442695, %v761_v15  ;;  %v764_v42 = vmul.f32 1.442695, %v759_v37 }
 0x34a   :  { %1420 = vpow2.f32 %v752_v19  ;;  %v522_v41 = vadd.f32 %v1730_v13, %v241_v40  ;;  %v1784_v56 = vsub.s32 0, %v869_v62  ;;  %v397_v43 = vadd.f32 %v1728_v12, %v241_v40 }
 0x34b   :  { %1422 = vpow2.f32 %v754_v60 }
 0x34c   :  { %1424 = vpow2.f32 %v756_v17 }
 0x34d   :  { %1426 = vpow2.f32 %v766_v39  ;;  %v251_v44 = vpop.permute.xlu0 %250 }
 0x34e   :  { %1428 = vpow2.f32 %v768_v57  ;;  %v407_v51 = vadd.f32 %v1734_v18, %v251_v44  ;;  %v532_v61 = vadd.f32 %v1771_v16, %v251_v44 }
 0x34f   :  { %1430 = vpow2.f32 %v764_v42 }
 0x352   :  { %v1417_v0 = vpop.eup %1416 }
 0x353   :  { %v1419_v1 = vpop.eup %1418  ;;  %v871_v25 = vrot.slane %v1417_v0, %v1784_v56 }
 0x354   :  { %v1421_v63 = vpop.eup %1420  ;;  %v891_v28 = vrot.slane %v1419_v1, %v1784_v56 }
 0x355   :  { %v1423_v13 = vpop.eup %1422  ;;  %v884_v46 = vmul.f32 %v871_v25, %v397_v43  ;;  %v875_v47 = vrot.slane %v1421_v63, %v1784_v56  ;;  %v774_v48 = vrot.slane %v1421_v63, 7 }
 0x356   :  { %v1425_v49 = vpop.eup %1424  ;;  %v879_v50 = vrot.slane %v1423_v13, %v1784_v56  ;;  %v776_v52 = vrot.slane %v1423_v13, 6  ;;  %v904_v53 = vmul.f32 %v891_v28, %v522_v41 }
 0x357   :  { %v1427_v12 = vpop.eup %1426  ;;  %1348 = vmatprep.mubr.msk.f32.mxu1 %vm39_vm0, %v884_v46  ;;  %v885_v54 = vmul.f32 %v875_v47, %v402_v45  ;;  %v775_v55 = vsel %vm714_vm3, %v774_v48, %v1417_v0  ;;  %v778_v58 = vrot.slane %v1425_v49, 5  ;;  %v883_v7 = vrot.slane %v1425_v49, %v1784_v56  ;;  %v1190_v46 = vld [vmem:[%s1853_s7] ss:$0 sm:$0xff] }
 0x358   :  { %v1429_v20 = vpop.eup %1428  ;;  %v886_v2 = vmul.f32 %v879_v50, %v407_v51  ;;  %v777_v4 = vsel %vm716_vm4, %v776_v52, %v775_v55  ;;  %v899_v5 = vrot.slane %v1427_v12, %v1784_v56 }
 0x359   :  { %v1431_v18 = vpop.eup %1430  ;;  %1349 = vmatmul.mubr.msk.f32.vlgmr.msra.gmra.mrb[16].mxu1 %vm39_vm0, %v885_v54  ;;  %v779_v8 = vsel %vm718_vm5, %v778_v58, %v777_v4  ;;  %v903_v10 = vrot.slane %v1429_v20, %v1784_v56  ;;  %v887_v27 = vmul.f32 %v883_v7, %v412_v6 }
 0x35a   :  { %1338 = vmatmul.mubr.msk.f32.vlgmr.msra.gmra.mrb[16].mxu0 %vm39_vm0, %v779_v8  ;;  %1351 = vmatprep.mubr.msk.f32.mxu1 %vm39_vm0, %v886_v2  ;;  %v895_v16 = vrot.slane %v1431_v18, %v1784_v56  ;;  %v906_v26 = vmul.f32 %v899_v5, %v532_v61 }
 0x35b   :  { %v907_v29 = vmul.f32 %v903_v10, %v1746_v23  ;;  %1362 = vmatprep.mubr.msk.f32.mxu0 %vm1466_vm8, %v1467_v24  ;;  %v1404_v23 = vpack.c.bf16 %v194_v30, %v193_v22  ;;  %v196_v24 = vld [vmem:[%s1852_s6 + $0x18] sm:$0xff] }
 0x35c   :  { %v905_v14 = vmul.f32 %v895_v16, %v1741_v21  ;;  %v1407_v21 = vpack.c.bf16 %v196_v24, %v195_v31 }
 0x35d   :  { %1352 = vmatmul.mubr.msk.f32.gmra.mrb[18].mxu1 %vm39_vm0, %v887_v27  ;;  %1405 = vmatpush3.bf16.msra.mxu0 %v1404_v23 }
 0x35e   :  { %1406 = vmatprep.subr.bf16.mxu0 %v1465_v11 }
 0x361   :  { %1408 = vmatpush3.bf16.msra.mxu0 %v1407_v21 }
 0x42c   :  { %v1350_v3 = vpop.f32.mrb[16].mxu1 }
 0x42d   :  { %v992_v32 = vadd.f32 %v1350_v3, %v905_v14  ;;  %v848_v33 = vpop.f32.mrb[16].mxu0  ;;  %v986_v34 = vpop.f32.mrb[17].mxu1 }
 0x42e   :  { %v853_v35 = vrot.slane %v848_v33, 1  ;;  %v854_v9 = vrot.slane %v848_v33, 2  ;;  %v855_v36 = vrot.slane %v848_v33, 3  ;;  %v860_v37 = vadd.f32 %v1419_v1, %v848_v33  ;;  %v1339_v59 = vpop.f32.mrb[17].mxu0 }
 0x42f   :  { %v987_v15 = vadd.f32 %v986_v34, %v904_v53 }
 0x430   :  { %v861_v38 = vadd.f32 %v1431_v18, %v853_v35  ;;  %v862_v19 = vadd.f32 %v1427_v12, %v854_v9  ;;  %v863_v60 = vadd.f32 %v1429_v20, %v855_v36  ;;  %1432 = vrcp.f32 %v860_v37  ;;  %v1353_v17 = vpop.f32.mrb[18].mxu1 }
 0x431   :  { %v1002_v39 = vadd.f32 %v1353_v17, %v907_v29  ;;  %v996_v40 = vpop.f32.mrb[19].mxu1 }
 0x432   :  { %1434 = vrcp.f32 %v861_v38  ;;  %v997_v11 = vadd.f32 %v996_v40, %v906_v26 }
 0x433   :  { %1436 = vrcp.f32 %v862_v19 }
 0x434   :  { %1438 = vrcp.f32 %v863_v60 }
 0x43a   :  { %v1433_v57 = vpop.eup %1432 }
 0x43b   :  { %v1008_v41 = vrot.slane %v1433_v57, %v1784_v56 }
 0x43c   :  { %v1435_v42 = vpop.eup %1434 }
 0x43d   :  { %v1437_v62 = vpop.eup %1436  ;;  %v1021_v0 = vmul.f32 %v1008_v41, %v987_v15  ;;  %v1012_v1 = vrot.slane %v1435_v42, %v1784_v56 }
 0x43e   :  { %v1439_v25 = vpop.eup %1438  ;;  %v1016_v43 = vrot.slane %v1437_v62, %v1784_v56 }
 0x43f   :  { %v1020_v44 = vrot.slane %v1439_v25, %v1784_v56  ;;  %1025 = vxpose.xlu0.b32.start [1/4] (short) (narrow) %v1021_v0, 8  ;;  %v1022_v63 = vmul.f32 %v1012_v1, %v992_v32 }
 0x440   :  { %v1023_v28 = vmul.f32 %v1016_v43, %v997_v11 }
 0x441   :  { %v1024_v13 = vmul.f32 %v1020_v44, %v1002_v39 }
 0x443   :  { %1026 = vxpose.xlu0.b32.cont [2/4] (short) (narrow) %v1022_v63, 8 }
 0x447   :  { %1027 = vxpose.xlu0.b32.cont [3/4] (short) (narrow) %v1023_v28, 8 }
 0x44b   :  { %1028 = vxpose.xlu0.b32.end [4/4] (short) (narrow) %v1024_v13, 8 }
 0x4bf   :  { %v1041_v45 = vpop.trf.xlu0 }
 0x4c0   :  { %1363 = vmatmul.mubr.msk.f32.vlgmr.msra.gmra.mrb[18].mxu0 %vm39_vm0, %v1041_v45 }
 0x593   :  { %v1132_v47 = vpop.f32.mrb[18].mxu0 }
 0x594   :  { %v1133_v48 = vadd.f32 %v1190_v46, %v1132_v47  ;;  %v1364_v56 = vpop.f32.mrb[19].mxu0 }
 0x596   :  { %1137 = vst.msk [vmem:[#allocation2] sm:$0x3] %vm1136_vm9, %v1133_v48 }
 0x597   :  { %1451 = shalt.err (!%p1448_p4)
}
 0x598   :  { %s1452_s15 = scalar_lea.hbm %s1854_s8, 32 }
 0x599   :  { %p1453_p5 = scmp.ne.s32.totalorder %s1854_s8, %s1452_s15  ;;  %p1456_p6 = scmp.lt.u32.totalorder %s1452_s15, %s1854_s8 }
 0x59b   :  { %p1458_p7 = pnand %p1456_p6, %p1453_p5 }
 0x59d   :  { %1461 = shalt.err (!%p1458_p7)
}
 0x59e   :  { %1147 = dma.vmem_to_hbm [thread:$0]  %s1145_s12, 32, %s1854_s8, [#allocation3]  }
 0x59f   :  { %1462 = dma.done.wait [#allocation3], 32  }
 0x5a0   :  { %1463 = vsyncadd [#allocation3], 4294967264 }
 0x5a1   :  { %1151 = vsyncpa [#allocation3], 1 }

</bundles_post_ra>
